<compile_context>
chip_gen: v5e
topology: v5e:2x2
jax: 0.10.0
libtpu: 0.0.40
codegen_flags: <defaults>
</compile_context>

<pallas_src>
import functools

import jax
import jax.numpy as jnp
from jax.experimental import pallas as pl
from jax.experimental.pallas import tpu as pltpu

LANE = 128


def _round_up(x, m):
    return ((x + m - 1) // m) * m


def _textcnn_kernel(x_ref, wc_ref, bc_ref, wf_ref, bf_ref, o_ref, *, kh, w, t_len):
    # x_ref : (H*W, TB)     batch-on-lanes input slab for TB batch rows
    # wc_ref: (NHp, KH*W)   flattened conv weight (rows zero-padded)
    # bc_ref: (NHp, 1)      conv bias (zero-padded)
    # wf_ref: (NCp, NHp)    fc weight (zero-padded)
    # bf_ref: (NCp, 1)      fc bias (zero-padded)
    # o_ref : (NCp, TB)     transposed, lane-dense logits block
    wc = wc_ref[...]                                   # hoist weight load
    kw = kh * w

    def conv_at(t):                                    # (NHp, TB)
        win = x_ref[pl.ds(t * w, kw), :]               # static, sublane slice
        return jnp.dot(wc, win, preferred_element_type=jnp.float32)

    # Running max over time of the raw conv terms (bias/ReLU hoisted out).
    # TODO(synk): switch to lax.fori_loop(..., unroll=True) if T grows large.
    pooled = conv_at(0)
    for t in range(1, t_len):
        pooled = jnp.maximum(pooled, conv_at(t))

    act = jnp.maximum(pooled + bc_ref[...], 0.0)       # (NHp, TB)
    logits = jnp.dot(wf_ref[...], act, preferred_element_type=jnp.float32)
    o_ref[...] = (logits + bf_ref[...]).astype(o_ref.dtype)


def textcnn1_forward(x, conv_w, conv_b, fc_w, fc_b, *, max_tb=256):
    """x: (B, H, W) float32.  conv_w: (NH, 1, KH, KW=W).  fc_w: (NC, NH)."""
    B, H, W = x.shape
    NH, _, KH, KW = conv_w.shape
    assert KW == W, "TextCNN expects conv kernel width == embedding dim"
    assert H >= KH, "sequence length must be >= kernel height"
    NC = fc_w.shape[0]
    T = H - KH + 1

    NHp = _round_up(NH, LANE)
    NCp = _round_up(NC, LANE)

    # Batch tile (lane dim): multiple of 128, capped for vreg pressure, and
    # split so the grid has >= 2 steps (v7x dual-TC) whenever the batch allows.
    Bp_lane = _round_up(B, LANE)
    TB = min(max_tb, Bp_lane)
    if Bp_lane > LANE and Bp_lane // TB < 2:
        TB = _round_up((Bp_lane + 1) // 2, LANE)
    Bp = _round_up(Bp_lane, TB)

    # Wrapper-side glue (plain XLA): batch-on-lanes relayout + zero padding.
    xt = jnp.transpose(x, (1, 2, 0)).reshape(H * W, B)          # (H*W, B)
    if Bp != B:
        xt = jnp.pad(xt, ((0, 0), (0, Bp - B)))                 # (H*W, Bp)

    wc = conv_w.reshape(NH, KH * W)                             # (NH, KH*W)
    wc = jnp.pad(wc, ((0, NHp - NH), (0, 0)))                   # (NHp, KH*W)
    bc = jnp.pad(conv_b, (0, NHp - NH)).reshape(NHp, 1)
    wf = jnp.pad(fc_w, ((0, NCp - NC), (0, NHp - NH)))          # (NCp, NHp)
    bf = jnp.pad(fc_b, (0, NCp - NC)).reshape(NCp, 1)

    kernel = functools.partial(_textcnn_kernel, kh=KH, w=W, t_len=T)

    out = pl.pallas_call(
        kernel,
        out_shape=jax.ShapeDtypeStruct((NCp, Bp), jnp.float32),
        grid_spec=pltpu.PrefetchScalarGridSpec(
            num_scalar_prefetch=0,
            grid=(Bp // TB,),
            in_specs=[
                pl.BlockSpec((H * W, TB), lambda b: (0, b)),
                pl.BlockSpec((NHp, KH * W), lambda b: (0, 0)),
                pl.BlockSpec((NHp, 1), lambda b: (0, 0)),
                pl.BlockSpec((NCp, NHp), lambda b: (0, 0)),
                pl.BlockSpec((NCp, 1), lambda b: (0, 0)),
            ],
            out_specs=pl.BlockSpec((NCp, TB), lambda b: (0, b)),
        ),
        compiler_params=pltpu.CompilerParams(
            dimension_semantics=("parallel",)),
    )(xt, wc, bc, wf, bf)

    return out[:NC, :B].T                                       # (B, NC)


def textcnn1_reference(x, conv_w, conv_b, fc_w, fc_b):
    """Pure-JAX reference mirroring the PyTorch forward exactly."""
    B, H, W = x.shape
    NH, _, KH, _ = conv_w.shape
    T = H - KH + 1
    wc = conv_w.reshape(NH, KH * W)
    patches = jnp.stack(
        [x[:, t:t + KH, :].reshape(B, KH * W) for t in range(T)], axis=1)  # (B,T,KH*W)
    conv = jnp.einsum("btk,nk->btn", patches, wc) + conv_b[None, None, :]
    act = jnp.maximum(conv, 0.0)
    pooled = jnp.max(act, axis=1)                 # (B, NH)
    return pooled @ fc_w.T + fc_b[None, :]


if __name__ == "__main__":
    # small shapes consistent with the module
    B, H, W = 2, 16, 8        # batch, seq_len, embed_dim
    KH = 3                    # kernels = (3, embed_dim)
    NH = 32                   # num_hidden
    NC = 4                    # n_class

    key = jax.random.PRNGKey(0)
    kx, kcw, kcb, kfw, kfb = jax.random.split(key, 5)

    x = jax.random.normal(kx, (B, H, W), dtype=jnp.float32)
    # deterministic synthetic parameters (shapes match nn.Conv2d / nn.Linear)
    conv_w = jax.random.normal(kcw, (NH, 1, KH, W), dtype=jnp.float32) * 0.1
    conv_b = jax.random.normal(kcb, (NH,), dtype=jnp.float32) * 0.1
    fc_w = jax.random.normal(kfw, (NC, NH), dtype=jnp.float32) * 0.1
    fc_b = jax.random.normal(kfb, (NC,), dtype=jnp.float32) * 0.1

    out = textcnn1_forward(x, conv_w, conv_b, fc_w, fc_b)
    out = jax.block_until_ready(out)

    ref = textcnn1_reference(x, conv_w, conv_b, fc_w, fc_b)
    assert out.shape == (B, NC)
    assert jnp.allclose(out, ref, atol=1e-4, rtol=1e-4), (out, ref)

    print("KERNEL_OK")
</pallas_src>

<mosaic_0001>
module attributes {stable_mosaic.version = 11 : i64} {
  func.func @_textcnn_kernel(%arg0: i32, %arg1: memref<128x128xf32, #tpu.memory_space<vmem>>, %arg2: memref<128x24xf32, #tpu.memory_space<vmem>>, %arg3: memref<128x1xf32, #tpu.memory_space<vmem>>, %arg4: memref<128x128xf32, #tpu.memory_space<vmem>>, %arg5: memref<128x1xf32, #tpu.memory_space<vmem>>, %arg6: memref<128x128xf32, #tpu.memory_space<vmem>>) attributes {dimension_semantics = [#tpu.dimension_semantics<parallel>], iteration_bounds = array<i64: 1>, scalar_prefetch = 0 : i64, scratch_operands = 0 : i64, tpu.core_type = #tpu.core_type<tc>, window_params = [{transform_indices = @transform_0, window_bounds = array<i64: 128, 128>}, {pipeline_mode = #tpu.pipeline_mode<synchronous>, transform_indices = @transform_1, window_bounds = array<i64: 128, 24>}, {pipeline_mode = #tpu.pipeline_mode<synchronous>, transform_indices = @transform_2, window_bounds = array<i64: 128, 1>}, {pipeline_mode = #tpu.pipeline_mode<synchronous>, transform_indices = @transform_3, window_bounds = array<i64: 128, 128>}, {pipeline_mode = #tpu.pipeline_mode<synchronous>, transform_indices = @transform_4, window_bounds = array<i64: 128, 1>}, {transform_indices = @transform_5, window_bounds = array<i64: 128, 128>}]} {
    %c0 = arith.constant 0 : index
    %c0_0 = arith.constant 0 : index
    %0 = vector.load %arg2[%c0, %c0_0] : memref<128x24xf32, #tpu.memory_space<vmem>>, vector<128x24xf32>
    %c0_1 = arith.constant 0 : index
    %c0_2 = arith.constant 0 : index
    %1 = vector.load %arg1[%c0_1, %c0_2] : memref<128x128xf32, #tpu.memory_space<vmem>>, vector<24x128xf32>
    %cst = arith.constant dense<0.000000e+00> : vector<128x128xf32>
    %2 = tpu.matmul %0, %1, %cst {dimension_numbers = #tpu.dot_dimension_numbers<[1], [0], [0], [1], [0, 0, 1, 1], [], []>} : vector<128x24xf32>, vector<24x128xf32>, vector<128x128xf32> -> vector<128x128xf32>
    %c8 = arith.constant 8 : index
    %c0_3 = arith.constant 0 : index
    %3 = vector.load %arg1[%c8, %c0_3] : memref<128x128xf32, #tpu.memory_space<vmem>>, vector<24x128xf32>
    %cst_4 = arith.constant dense<0.000000e+00> : vector<128x128xf32>
    %4 = tpu.matmul %0, %3, %cst_4 {dimension_numbers = #tpu.dot_dimension_numbers<[1], [0], [0], [1], [0, 0, 1, 1], [], []>} : vector<128x24xf32>, vector<24x128xf32>, vector<128x128xf32> -> vector<128x128xf32>
    %5 = arith.maximumf %2, %4 : vector<128x128xf32>
    %c16 = arith.constant 16 : index
    %c0_5 = arith.constant 0 : index
    %6 = vector.load %arg1[%c16, %c0_5] : memref<128x128xf32, #tpu.memory_space<vmem>>, vector<24x128xf32>
    %cst_6 = arith.constant dense<0.000000e+00> : vector<128x128xf32>
    %7 = tpu.matmul %0, %6, %cst_6 {dimension_numbers = #tpu.dot_dimension_numbers<[1], [0], [0], [1], [0, 0, 1, 1], [], []>} : vector<128x24xf32>, vector<24x128xf32>, vector<128x128xf32> -> vector<128x128xf32>
    %8 = arith.maximumf %5, %7 : vector<128x128xf32>
    %c24 = arith.constant 24 : index
    %c0_7 = arith.constant 0 : index
    %9 = vector.load %arg1[%c24, %c0_7] : memref<128x128xf32, #tpu.memory_space<vmem>>, vector<24x128xf32>
    %cst_8 = arith.constant dense<0.000000e+00> : vector<128x128xf32>
    %10 = tpu.matmul %0, %9, %cst_8 {dimension_numbers = #tpu.dot_dimension_numbers<[1], [0], [0], [1], [0, 0, 1, 1], [], []>} : vector<128x24xf32>, vector<24x128xf32>, vector<128x128xf32> -> vector<128x128xf32>
    %11 = arith.maximumf %8, %10 : vector<128x128xf32>
    %c32 = arith.constant 32 : index
    %c0_9 = arith.constant 0 : index
    %12 = vector.load %arg1[%c32, %c0_9] : memref<128x128xf32, #tpu.memory_space<vmem>>, vector<24x128xf32>
    %cst_10 = arith.constant dense<0.000000e+00> : vector<128x128xf32>
    %13 = tpu.matmul %0, %12, %cst_10 {dimension_numbers = #tpu.dot_dimension_numbers<[1], [0], [0], [1], [0, 0, 1, 1], [], []>} : vector<128x24xf32>, vector<24x128xf32>, vector<128x128xf32> -> vector<128x128xf32>
    %14 = arith.maximumf %11, %13 : vector<128x128xf32>
    %c40 = arith.constant 40 : index
    %c0_11 = arith.constant 0 : index
    %15 = vector.load %arg1[%c40, %c0_11] : memref<128x128xf32, #tpu.memory_space<vmem>>, vector<24x128xf32>
    %cst_12 = arith.constant dense<0.000000e+00> : vector<128x128xf32>
    %16 = tpu.matmul %0, %15, %cst_12 {dimension_numbers = #tpu.dot_dimension_numbers<[1], [0], [0], [1], [0, 0, 1, 1], [], []>} : vector<128x24xf32>, vector<24x128xf32>, vector<128x128xf32> -> vector<128x128xf32>
    %17 = arith.maximumf %14, %16 : vector<128x128xf32>
    %c48 = arith.constant 48 : index
    %c0_13 = arith.constant 0 : index
    %18 = vector.load %arg1[%c48, %c0_13] : memref<128x128xf32, #tpu.memory_space<vmem>>, vector<24x128xf32>
    %cst_14 = arith.constant dense<0.000000e+00> : vector<128x128xf32>
    %19 = tpu.matmul %0, %18, %cst_14 {dimension_numbers = #tpu.dot_dimension_numbers<[1], [0], [0], [1], [0, 0, 1, 1], [], []>} : vector<128x24xf32>, vector<24x128xf32>, vector<128x128xf32> -> vector<128x128xf32>
    %20 = arith.maximumf %17, %19 : vector<128x128xf32>
    %c56 = arith.constant 56 : index
    %c0_15 = arith.constant 0 : index
    %21 = vector.load %arg1[%c56, %c0_15] : memref<128x128xf32, #tpu.memory_space<vmem>>, vector<24x128xf32>
    %cst_16 = arith.constant dense<0.000000e+00> : vector<128x128xf32>
    %22 = tpu.matmul %0, %21, %cst_16 {dimension_numbers = #tpu.dot_dimension_numbers<[1], [0], [0], [1], [0, 0, 1, 1], [], []>} : vector<128x24xf32>, vector<24x128xf32>, vector<128x128xf32> -> vector<128x128xf32>
    %23 = arith.maximumf %20, %22 : vector<128x128xf32>
    %c64 = arith.constant 64 : index
    %c0_17 = arith.constant 0 : index
    %24 = vector.load %arg1[%c64, %c0_17] : memref<128x128xf32, #tpu.memory_space<vmem>>, vector<24x128xf32>
    %cst_18 = arith.constant dense<0.000000e+00> : vector<128x128xf32>
    %25 = tpu.matmul %0, %24, %cst_18 {dimension_numbers = #tpu.dot_dimension_numbers<[1], [0], [0], [1], [0, 0, 1, 1], [], []>} : vector<128x24xf32>, vector<24x128xf32>, vector<128x128xf32> -> vector<128x128xf32>
    %26 = arith.maximumf %23, %25 : vector<128x128xf32>
    %c72 = arith.constant 72 : index
    %c0_19 = arith.constant 0 : index
    %27 = vector.load %arg1[%c72, %c0_19] : memref<128x128xf32, #tpu.memory_space<vmem>>, vector<24x128xf32>
    %cst_20 = arith.constant dense<0.000000e+00> : vector<128x128xf32>
    %28 = tpu.matmul %0, %27, %cst_20 {dimension_numbers = #tpu.dot_dimension_numbers<[1], [0], [0], [1], [0, 0, 1, 1], [], []>} : vector<128x24xf32>, vector<24x128xf32>, vector<128x128xf32> -> vector<128x128xf32>
    %29 = arith.maximumf %26, %28 : vector<128x128xf32>
    %c80 = arith.constant 80 : index
    %c0_21 = arith.constant 0 : index
    %30 = vector.load %arg1[%c80, %c0_21] : memref<128x128xf32, #tpu.memory_space<vmem>>, vector<24x128xf32>
    %cst_22 = arith.constant dense<0.000000e+00> : vector<128x128xf32>
    %31 = tpu.matmul %0, %30, %cst_22 {dimension_numbers = #tpu.dot_dimension_numbers<[1], [0], [0], [1], [0, 0, 1, 1], [], []>} : vector<128x24xf32>, vector<24x128xf32>, vector<128x128xf32> -> vector<128x128xf32>
    %32 = arith.maximumf %29, %31 : vector<128x128xf32>
    %c88 = arith.constant 88 : index
    %c0_23 = arith.constant 0 : index
    %33 = vector.load %arg1[%c88, %c0_23] : memref<128x128xf32, #tpu.memory_space<vmem>>, vector<24x128xf32>
    %cst_24 = arith.constant dense<0.000000e+00> : vector<128x128xf32>
    %34 = tpu.matmul %0, %33, %cst_24 {dimension_numbers = #tpu.dot_dimension_numbers<[1], [0], [0], [1], [0, 0, 1, 1], [], []>} : vector<128x24xf32>, vector<24x128xf32>, vector<128x128xf32> -> vector<128x128xf32>
    %35 = arith.maximumf %32, %34 : vector<128x128xf32>
    %c96 = arith.constant 96 : index
    %c0_25 = arith.constant 0 : index
    %36 = vector.load %arg1[%c96, %c0_25] : memref<128x128xf32, #tpu.memory_space<vmem>>, vector<24x128xf32>
    %cst_26 = arith.constant dense<0.000000e+00> : vector<128x128xf32>
    %37 = tpu.matmul %0, %36, %cst_26 {dimension_numbers = #tpu.dot_dimension_numbers<[1], [0], [0], [1], [0, 0, 1, 1], [], []>} : vector<128x24xf32>, vector<24x128xf32>, vector<128x128xf32> -> vector<128x128xf32>
    %38 = arith.maximumf %35, %37 : vector<128x128xf32>
    %c104 = arith.constant 104 : index
    %c0_27 = arith.constant 0 : index
    %39 = vector.load %arg1[%c104, %c0_27] : memref<128x128xf32, #tpu.memory_space<vmem>>, vector<24x128xf32>
    %cst_28 = arith.constant dense<0.000000e+00> : vector<128x128xf32>
    %40 = tpu.matmul %0, %39, %cst_28 {dimension_numbers = #tpu.dot_dimension_numbers<[1], [0], [0], [1], [0, 0, 1, 1], [], []>} : vector<128x24xf32>, vector<24x128xf32>, vector<128x128xf32> -> vector<128x128xf32>
    %41 = arith.maximumf %38, %40 : vector<128x128xf32>
    %c0_29 = arith.constant 0 : index
    %c0_30 = arith.constant 0 : index
    %42 = vector.load %arg3[%c0_29, %c0_30] : memref<128x1xf32, #tpu.memory_space<vmem>>, vector<128x1xf32>
    %43 = vector.broadcast %42 : vector<128x1xf32> to vector<128x128xf32>
    %44 = arith.addf %41, %43 : vector<128x128xf32>
    %cst_31 = arith.constant 0.000000e+00 : f32
    %45 = vector.broadcast %cst_31 : f32 to vector<128x128xf32>
    %46 = arith.maximumf %44, %45 : vector<128x128xf32>
    %c0_32 = arith.constant 0 : index
    %c0_33 = arith.constant 0 : index
    %47 = vector.load %arg4[%c0_32, %c0_33] : memref<128x128xf32, #tpu.memory_space<vmem>>, vector<128x128xf32>
    %cst_34 = arith.constant dense<0.000000e+00> : vector<128x128xf32>
    %48 = tpu.matmul %47, %46, %cst_34 {dimension_numbers = #tpu.dot_dimension_numbers<[1], [0], [0], [1], [0, 0, 1, 1], [], []>} : vector<128x128xf32>, vector<128x128xf32>, vector<128x128xf32> -> vector<128x128xf32>
    %c0_35 = arith.constant 0 : index
    %c0_36 = arith.constant 0 : index
    %49 = vector.load %arg5[%c0_35, %c0_36] : memref<128x1xf32, #tpu.memory_space<vmem>>, vector<128x1xf32>
    %50 = vector.broadcast %49 : vector<128x1xf32> to vector<128x128xf32>
    %51 = arith.addf %48, %50 : vector<128x128xf32>
    %c0_37 = arith.constant 0 : index
    %c0_38 = arith.constant 0 : index
    %52 = vector.load %arg6[%c0_37, %c0_38] : memref<128x128xf32, #tpu.memory_space<vmem>>, vector<128x128xf32>
    tpu.vector_store %arg6[%c0_37, %c0_38], %51 {strides = array<i32>} : memref<128x128xf32, #tpu.memory_space<vmem>>, vector<128x128xf32>,
    return
  }
  func.func @transform_0(%arg0: i32) -> (i32, i32) {
    %c0_i32 = arith.constant 0 : i32
    %c0_i32_0 = arith.constant 0 : i32
    return %c0_i32, %arg0 : i32, i32
  }
  func.func @transform_1(%arg0: i32) -> (i32, i32) {
    %c0_i32 = arith.constant 0 : i32
    %c0_i32_0 = arith.constant 0 : i32
    %c0_i32_1 = arith.constant 0 : i32
    return %c0_i32, %c0_i32_0 : i32, i32
  }
  func.func @transform_2(%arg0: i32) -> (i32, i32) {
    %c0_i32 = arith.constant 0 : i32
    %c0_i32_0 = arith.constant 0 : i32
    %c0_i32_1 = arith.constant 0 : i32
    return %c0_i32, %c0_i32_0 : i32, i32
  }
  func.func @transform_3(%arg0: i32) -> (i32, i32) {
    %c0_i32 = arith.constant 0 : i32
    %c0_i32_0 = arith.constant 0 : i32
    %c0_i32_1 = arith.constant 0 : i32
    return %c0_i32, %c0_i32_0 : i32, i32
  }
  func.func @transform_4(%arg0: i32) -> (i32, i32) {
    %c0_i32 = arith.constant 0 : i32
    %c0_i32_0 = arith.constant 0 : i32
    %c0_i32_1 = arith.constant 0 : i32
    return %c0_i32, %c0_i32_0 : i32, i32
  }
  func.func @transform_5(%arg0: i32) -> (i32, i32) {
    %c0_i32 = arith.constant 0 : i32
    %c0_i32_0 = arith.constant 0 : i32
    return %c0_i32, %arg0 : i32, i32
  }
}

</mosaic_0001>

<bundles_post_ra>
// kernel: tpu_custom_call.1
= control target key start
LH: loop header
LB: loop body
LE: loop exit
PB: predicated region body
PF: predicated region fallthrough
CT: control target
= control target key end

     0   :  { %vm40_vm0 = vcmask 195584   ;;  %s3153_s0 = inlined_call_operand.vmem [shape: f32[128,128], index: 0, kind: input, shape index: {}]   ;;  %s3154_s1 = inlined_call_operand.vmem [shape: f32[128,24], index: 1, kind: input, shape index: {}]   ;;  %s3155_s2 = inlined_call_operand.vmem [shape: f32[128,1], index: 2, kind: input, shape index: {}]   ;;  %s3156_s3 = inlined_call_operand.vmem [shape: f32[128,128], index: 3, kind: input, shape index: {}]   ;;  %s3157_s4 = inlined_call_operand.vmem [shape: f32[128,1], index: 4, kind: input, shape index: {}]   ;;  %s3158_s5 = inlined_call_operand.hbm [shape: f32[128,128], index: 5, kind: output, shape index: {}]  }
   0x1   :  { %v39_v0 = vld [vmem:[%s3153_s0 + $0x10] sm:$0xff]  ;;  %v38_v1 = vld [vmem:[%s3153_s0 + $0x8] sm:$0xff]  ;;  %v1901_v2 = vld [vmem:[%s3153_s0 + $0x20] sm:$0xff] }
   0x2   :  { %1809 = vmatpush.msra.mxu3 %v39_v0  ;;  %v1906_v3 = vld [vmem:[%s3153_s0 + $0x18] sm:$0xff]  ;;  %102 = vmatpush.msra.mxu0 %v39_v0  ;;  %v37_v4 = vld [vmem:[%s3153_s0] sm:$0xff] }
   0x3   :  { %254 = vmatpush.msra.mxu2 %v1901_v2  ;;  %170 = vmatpush.msra.mxu1 %v1906_v3  ;;  %v1916_v5 = vld [vmem:[%s3154_s1 + $0x60] sm:$0xff] }
   0x4   :  { %1810 = vmatpush.msra.mxu3 %v38_v1  ;;  %103 = vmatpush.msra.mxu0 %v38_v1  ;;  %v1922_v6 = vld [vmem:[%s3154_s1] sm:$0xff] }
   0x5   :  { %255 = vmatpush.msra.mxu2 %v1906_v3  ;;  %171 = vmatpush.msra.mxu1 %v39_v0 }
   0x6   :  { %10 = vsyncpa [#allocation3], 0  ;;  %1811 = vmatpush.msra.mxu3 %v37_v4  ;;  %104 = vmatpush.msra.mxu0 %v37_v4  ;;  %v1936_v7 = vld [vmem:[%s3154_s1 + $0x68] sm:$0xff]  ;;  %v1956_v9 = vld [vmem:[%s3154_s1 + $0x70] sm:$0xff]  ;;  %s1860_s9 = smov 128   ;;  %s1861_s10 = smov 8  }
   0x7   :  { %1597 = vmatmul.msk.f32.vlgmr.msra.gmra.mxu3 %vm40_vm0, %v1916_v5  ;;  %256 = vmatpush.msra.mxu2 %v39_v0  ;;  %v1941_v8 = vld [vmem:[%s3154_s1 + $0x8] sm:$0xff]  ;;  %3172 = vst [vmem:[#allocation5_spill] sm:$0xff] %v1956_v9  ;;  %v1961_v10 = vld [vmem:[%s3154_s1 + $0x10] sm:$0xff]  ;;  %v1974_v11 = vld [vmem:[%s3154_s1 + $0x78] sm:$0xff] }
   0x8   :  { %1617 = vmatmul.msk.f32.vlgmr.msra.gmra.mxu2 %vm40_vm0, %v1922_v6  ;;  %172 = vmatpush.msra.mxu1 %v38_v1  ;;  %3173 = vst [vmem:[#allocation6_spill] sm:$0xff] %v1974_v11  ;;  %v1979_v12 = vld [vmem:[%s3154_s1 + $0x18] sm:$0xff]  ;;  %v1992_v13 = vld [vmem:[%s3154_s1 + $0x20] sm:$0xff]  ;;  %v2005_v14 = vld [vmem:[%s3154_s1 + $0x28] sm:$0xff] }
   0x9   :  { %1585 = vmatmul.msk.f32.vlgmr.msra.gmra.mxu0 %vm40_vm0, %v1922_v6  ;;  %1601 = vmatmul.msk.f32.vlgmr.msra.gmra.mxu1 %vm40_vm0, %v1922_v6  ;;  %v2018_v15 = vld [vmem:[%s3154_s1 + $0x30] sm:$0xff]  ;;  %v2031_v16 = vld [vmem:[%s3154_s1 + $0x38] sm:$0xff]  ;;  %v324_v17 = vld [vmem:[%s3153_s0 + $0x28] sm:$0xff] }
   0xa   :  { %1812 = vmatpush.msrb.mxu3 %v1906_v3  ;;  %v2049_v18 = vld [vmem:[%s3154_s1 + $0x40] sm:$0xff]  ;;  %v408_v20 = vld [vmem:[%s3153_s0 + $0x30] sm:$0xff]  ;;  %v2070_v21 = vld [vmem:[%s3153_s0 + $0x38] sm:$0xff] }
   0xb   :  { %v2056_v19 = vld [vmem:[%s3153_s0 + $0x40] sm:$0xff]  ;;  %422 = vmatpush.msrb.mxu0 %v408_v20  ;;  %506 = vmatpush.msrb.mxu1 %v2070_v21  ;;  %v2079_v22 = vld [vmem:[%s3154_s1 + $0x48] sm:$0xff]  ;;  %v2092_v23 = vld [vmem:[%s3154_s1 + $0x50] sm:$0xff] }
   0xc   :  { %1813 = vmatpush.msrb.mxu3 %v39_v0  ;;  %590 = vmatpush.msrb.mxu2 %v2056_v19  ;;  %v2105_v24 = vld [vmem:[%s3154_s1 + $0x58] sm:$0xff]  ;;  %v660_v43 = vld [vmem:[%s3153_s0 + $0x48] sm:$0xff]  ;;  %v744_v49 = vld [vmem:[%s3153_s0 + $0x50] sm:$0xff] }
   0xd   :  { %423 = vmatpush.msrb.mxu0 %v324_v17  ;;  %507 = vmatpush.msrb.mxu1 %v408_v20  ;;  %v2252_v53 = vld [vmem:[%s3153_s0 + $0x58] sm:$0xff] }
   0xe   :  { %1814 = vmatpush.msrb.mxu3 %v38_v1  ;;  %591 = vmatpush.msrb.mxu2 %v2070_v21 }
   0xf   :  { %1598 = vmatmul.msk.f32.gmra.mxu3 %vm40_vm0, %v1936_v7  ;;  %424 = vmatpush.msrb.mxu0 %v1901_v2 }
  0x10   :  { %1618 = vmatmul.msk.f32.gmra.mxu2 %vm40_vm0, %v1941_v8  ;;  %1815 = vmatpush.msra.mxu3 %v1901_v2 }
  0x11   :  { %1586 = vmatmul.msk.f32.gmra.mxu0 %vm40_vm0, %v1941_v8  ;;  %1602 = vmatmul.msk.f32.gmra.mxu1 %vm40_vm0, %v1941_v8 }
  0x12   :  { %1816 = vmatpush.msra.mxu3 %v1906_v3  ;;  %592 = vmatpush.msrb.mxu2 %v408_v20 }
  0x13   :  { %508 = vmatpush.msrb.mxu1 %v324_v17  ;;  %758 = vmatpush.msra.mxu0 %v744_v49 }
  0x14   :  { %1817 = vmatpush.msra.mxu3 %v39_v0 }
  0x15   :  { %759 = vmatpush.msra.mxu0 %v660_v43  ;;  %842 = vmatpush.msra.mxu1 %v2252_v53 }
  0x17   :  { %1599 = vmatmul.msk.f32.gmra.mxu3 %vm40_vm0, %v1956_v9  ;;  %760 = vmatpush.msra.mxu0 %v2056_v19 }
  0x18   :  { %1619 = vmatmul.msk.f32.gmra.mxu2 %vm40_vm0, %v1961_v10  ;;  %843 = vmatpush.msra.mxu1 %v744_v49 }
  0x19   :  { %1587 = vmatmul.msk.f32.gmra.mxu0 %vm40_vm0, %v1961_v10  ;;  %1603 = vmatmul.msk.f32.gmra.mxu1 %vm40_vm0, %v1961_v10 }
  0x1a   :  { %844 = vmatpush.msra.mxu1 %v660_v43 }
  0x1f   :  { %1600 = vmatmul.msk.f32.gmra.mxu3 %vm40_vm0, %v1974_v11 }
  0x20   :  { %1620 = vmatmul.msk.f32.gmra.mxu2 %vm40_vm0, %v1979_v12 }
  0x21   :  { %1588 = vmatmul.msk.f32.gmra.mxu0 %vm40_vm0, %v1979_v12  ;;  %1604 = vmatmul.msk.f32.gmra.mxu1 %vm40_vm0, %v1979_v12 }
  0x27   :  { %1613 = vmatmul.msk.f32.vlgmr.msrb.gmra.mxu3 %vm40_vm0, %v1916_v5 }
  0x28   :  { %1621 = vmatmul.msk.f32.gmra.mxu2 %vm40_vm0, %v1992_v13  ;;  %338 = vmatpush.msrb.mxu3 %v324_v17 }
  0x29   :  { %1589 = vmatmul.msk.f32.gmra.mxu0 %vm40_vm0, %v1992_v13  ;;  %1605 = vmatmul.msk.f32.gmra.mxu1 %vm40_vm0, %v1992_v13 }
  0x2a   :  { %339 = vmatpush.msrb.mxu3 %v1901_v2  ;;  %v2295_v2 = vld [vmem:[%s3153_s0 + $0x60] sm:$0xff] }
  0x2b   :  { %926 = vmatpush.msra.mxu2 %v2295_v2 }
  0x2c   :  { %340 = vmatpush.msrb.mxu3 %v1906_v3 }
  0x2d   :  { %927 = vmatpush.msra.mxu2 %v2252_v53 }
  0x2f   :  { %1614 = vmatmul.msk.f32.gmra.mxu3 %vm40_vm0, %v1936_v7  ;;  %928 = vmatpush.msra.mxu2 %v744_v49 }
  0x30   :  { %1622 = vmatmul.msk.f32.gmra.mxu2 %vm40_vm0, %v2005_v14 }
  0x31   :  { %1590 = vmatmul.msk.f32.gmra.mxu0 %vm40_vm0, %v2005_v14  ;;  %1606 = vmatmul.msk.f32.gmra.mxu1 %vm40_vm0, %v2005_v14 }
  0x37   :  { %1615 = vmatmul.msk.f32.gmra.mxu3 %vm40_vm0, %v1956_v9 }
  0x38   :  { %1623 = vmatmul.msk.f32.gmra.mxu2 %vm40_vm0, %v2018_v15 }
  0x39   :  { %1591 = vmatmul.msk.f32.gmra.mxu0 %vm40_vm0, %v2018_v15  ;;  %1607 = vmatmul.msk.f32.gmra.mxu1 %vm40_vm0, %v2018_v15 }
  0x3f   :  { %1616 = vmatmul.msk.f32.gmra.mxu3 %vm40_vm0, %v1974_v11 }
  0x40   :  { %1624 = vmatmul.msk.f32.gmra.mxu2 %vm40_vm0, %v2031_v16 }
  0x41   :  { %1592 = vmatmul.msk.f32.gmra.mxu0 %vm40_vm0, %v2031_v16  ;;  %1608 = vmatmul.msk.f32.gmra.mxu1 %vm40_vm0, %v2031_v16 }
  0x47   :  { %1629 = vmatmul.msk.f32.vlgmr.msra.gmra.mxu3 %vm40_vm0, %v1916_v5 }
  0x48   :  { %1625 = vmatmul.msk.f32.gmra.mxu2 %vm40_vm0, %v2049_v18  ;;  %674 = vmatpush.msra.mxu3 %v660_v43 }
  0x49   :  { %1593 = vmatmul.msk.f32.gmra.mxu0 %vm40_vm0, %v2049_v18  ;;  %1609 = vmatmul.msk.f32.gmra.mxu1 %vm40_vm0, %v2049_v18 }
  0x4a   :  { %675 = vmatpush.msra.mxu3 %v2056_v19 }
  0x4c   :  { %676 = vmatpush.msra.mxu3 %v2070_v21 }
  0x4f   :  { %1630 = vmatmul.msk.f32.gmra.mxu3 %vm40_vm0, %v1936_v7 }
  0x50   :  { %1626 = vmatmul.msk.f32.gmra.mxu2 %vm40_vm0, %v2079_v22 }
  0x51   :  { %1594 = vmatmul.msk.f32.gmra.mxu0 %vm40_vm0, %v2079_v22  ;;  %1610 = vmatmul.msk.f32.gmra.mxu1 %vm40_vm0, %v2079_v22 }
  0x57   :  { %1631 = vmatmul.msk.f32.gmra.mxu3 %vm40_vm0, %v1956_v9 }
  0x58   :  { %1627 = vmatmul.msk.f32.gmra.mxu2 %vm40_vm0, %v2092_v23 }
  0x59   :  { %1595 = vmatmul.msk.f32.gmra.mxu0 %vm40_vm0, %v2092_v23  ;;  %1611 = vmatmul.msk.f32.gmra.mxu1 %vm40_vm0, %v2092_v23 }
  0x5f   :  { %1632 = vmatmul.msk.f32.gmra.mxu3 %vm40_vm0, %v1974_v11 }
  0x60   :  { %1628 = vmatmul.msk.f32.gmra.mxu2 %vm40_vm0, %v2105_v24 }
  0x61   :  { %1596 = vmatmul.msk.f32.gmra.mxu0 %vm40_vm0, %v2105_v24  ;;  %1612 = vmatmul.msk.f32.gmra.mxu1 %vm40_vm0, %v2105_v24 }
  0x67   :  { %1633 = vmatmul.msk.f32.vlgmr.msrb.gmra.mxu3 %vm40_vm0, %v1922_v6 }
  0x68   :  { %1681 = vmatmul.msk.f32.vlgmr.msrb.gmra.mxu2 %vm40_vm0, %v1922_v6 }
  0x69   :  { %1649 = vmatmul.msk.f32.vlgmr.msrb.gmra.mxu0 %vm40_vm0, %v1922_v6  ;;  %1665 = vmatmul.msk.f32.vlgmr.msrb.gmra.mxu1 %vm40_vm0, %v1922_v6 }
  0x6f   :  { %1634 = vmatmul.msk.f32.gmra.mxu3 %vm40_vm0, %v1941_v8 }
  0x70   :  { %1682 = vmatmul.msk.f32.gmra.mxu2 %vm40_vm0, %v1941_v8 }
  0x71   :  { %1650 = vmatmul.msk.f32.gmra.mxu0 %vm40_vm0, %v1941_v8  ;;  %1666 = vmatmul.msk.f32.gmra.mxu1 %vm40_vm0, %v1941_v8 }
  0x77   :  { %1635 = vmatmul.msk.f32.gmra.mxu3 %vm40_vm0, %v1961_v10 }
  0x78   :  { %1683 = vmatmul.msk.f32.gmra.mxu2 %vm40_vm0, %v1961_v10 }
  0x79   :  { %1651 = vmatmul.msk.f32.gmra.mxu0 %vm40_vm0, %v1961_v10  ;;  %1667 = vmatmul.msk.f32.gmra.mxu1 %vm40_vm0, %v1961_v10 }
  0x7f   :  { %1636 = vmatmul.msk.f32.gmra.mxu3 %vm40_vm0, %v1979_v12 }
  0x80   :  { %1684 = vmatmul.msk.f32.gmra.mxu2 %vm40_vm0, %v1979_v12 }
  0x81   :  { %1652 = vmatmul.msk.f32.gmra.mxu0 %vm40_vm0, %v1979_v12  ;;  %1668 = vmatmul.msk.f32.gmra.mxu1 %vm40_vm0, %v1979_v12 }
  0x86   :  { %v2147_v25 = vpop.f32.mrf.mxu0  ;;  %v2149_v26 = vpop.f32.mrf.mxu1 }
  0x87   :  { %1637 = vmatmul.msk.f32.gmra.mxu3 %vm40_vm0, %v1992_v13 }
  0x88   :  { %1685 = vmatmul.msk.f32.gmra.mxu2 %vm40_vm0, %v1992_v13 }
  0x89   :  { %1653 = vmatmul.msk.f32.gmra.mxu0 %vm40_vm0, %v1992_v13  ;;  %1669 = vmatmul.msk.f32.gmra.mxu1 %vm40_vm0, %v1992_v13 }
  0x8a   :  { %v2159_v27 = vpop.f32.mrf.mxu3 }
  0x8b   :  { %v2161_v28 = vpop.f32.mrf.mxu2 }
  0x8e   :  { %v2163_v29 = vpop.f32.mrf.mxu0  ;;  %v2165_v30 = vpop.f32.mrf.mxu1 }
  0x8f   :  { %1638 = vmatmul.msk.f32.gmra.mxu3 %vm40_vm0, %v2005_v14 }
  0x90   :  { %1686 = vmatmul.msk.f32.gmra.mxu2 %vm40_vm0, %v2005_v14 }
  0x91   :  { %1654 = vmatmul.msk.f32.gmra.mxu0 %vm40_vm0, %v2005_v14  ;;  %1670 = vmatmul.msk.f32.gmra.mxu1 %vm40_vm0, %v2005_v14 }
  0x92   :  { %v2175_v31 = vpop.f32.mrf.mxu3 }
  0x93   :  { %v2177_v32 = vpop.f32.mrf.mxu2 }
  0x96   :  { %v2179_v33 = vpop.f32.mrf.mxu0  ;;  %v2181_v34 = vpop.f32.mrf.mxu1 }
  0x97   :  { %1639 = vmatmul.msk.f32.gmra.mxu3 %vm40_vm0, %v2018_v15 }
  0x98   :  { %1687 = vmatmul.msk.f32.gmra.mxu2 %vm40_vm0, %v2018_v15 }
  0x99   :  { %1655 = vmatmul.msk.f32.gmra.mxu0 %vm40_vm0, %v2018_v15  ;;  %1671 = vmatmul.msk.f32.gmra.mxu1 %vm40_vm0, %v2018_v15 }
  0x9a   :  { %v2191_v35 = vpop.f32.mrf.mxu3 }
  0x9b   :  { %v2193_v36 = vpop.f32.mrf.mxu2 }
  0x9e   :  { %v2195_v37 = vpop.f32.mrf.mxu0  ;;  %v2197_v38 = vpop.f32.mrf.mxu1 }
  0x9f   :  { %1640 = vmatmul.msk.f32.gmra.mxu3 %vm40_vm0, %v2031_v16 }
  0xa0   :  { %1688 = vmatmul.msk.f32.gmra.mxu2 %vm40_vm0, %v2031_v16 }
  0xa1   :  { %1656 = vmatmul.msk.f32.gmra.mxu0 %vm40_vm0, %v2031_v16  ;;  %1672 = vmatmul.msk.f32.gmra.mxu1 %vm40_vm0, %v2031_v16 }
  0xa2   :  { %v2207_v39 = vpop.f32.mrf.mxu3 }
  0xa3   :  { %v2209_v40 = vpop.f32.mrf.mxu2 }
  0xa6   :  { %v2211_v41 = vpop.f32.mrf.mxu0  ;;  %v2213_v42 = vpop.f32.mrf.mxu1 }
  0xa7   :  { %1641 = vmatmul.msk.f32.gmra.mxu3 %vm40_vm0, %v2049_v18 }
  0xa8   :  { %1689 = vmatmul.msk.f32.gmra.mxu2 %vm40_vm0, %v2049_v18 }
  0xa9   :  { %1657 = vmatmul.msk.f32.gmra.mxu0 %vm40_vm0, %v2049_v18  ;;  %1673 = vmatmul.msk.f32.gmra.mxu1 %vm40_vm0, %v2049_v18 }
  0xaa   :  { %v210_v44 = vpop.f32.mrf.mxu3 }
  0xab   :  { %v234_v45 = vmax.f32 %v2159_v27, %v210_v44  ;;  %v2228_v46 = vpop.f32.mrf.mxu2 }
  0xae   :  { %v2231_v47 = vpop.f32.mrf.mxu0  ;;  %v2233_v48 = vpop.f32.mrf.mxu1 }
  0xaf   :  { %1642 = vmatmul.msk.f32.gmra.mxu3 %vm40_vm0, %v2079_v22 }
  0xb0   :  { %1690 = vmatmul.msk.f32.gmra.mxu2 %vm40_vm0, %v2079_v22 }
  0xb1   :  { %1658 = vmatmul.msk.f32.gmra.mxu0 %vm40_vm0, %v2079_v22  ;;  %1674 = vmatmul.msk.f32.gmra.mxu1 %vm40_vm0, %v2079_v22 }
  0xb2   :  { %v213_v50 = vpop.f32.mrf.mxu3 }
  0xb3   :  { %v235_v51 = vmax.f32 %v2175_v31, %v213_v50  ;;  %v2247_v52 = vpop.f32.mrf.mxu2 }
  0xb6   :  { %v2256_v54 = vpop.f32.mrf.mxu0  ;;  %v2258_v55 = vpop.f32.mrf.mxu1 }
  0xb7   :  { %1643 = vmatmul.msk.f32.gmra.mxu3 %vm40_vm0, %v2092_v23 }
  0xb8   :  { %1691 = vmatmul.msk.f32.gmra.mxu2 %vm40_vm0, %v2092_v23 }
  0xb9   :  { %1659 = vmatmul.msk.f32.gmra.mxu0 %vm40_vm0, %v2092_v23  ;;  %1675 = vmatmul.msk.f32.gmra.mxu1 %vm40_vm0, %v2092_v23 }
  0xba   :  { %v216_v56 = vpop.f32.mrf.mxu3 }
  0xbb   :  { %v236_v57 = vmax.f32 %v2191_v35, %v216_v56  ;;  %v2269_v58 = vpop.f32.mrf.mxu2 }
  0xbe   :  { %v2271_v59 = vpop.f32.mrf.mxu0  ;;  %v2273_v60 = vpop.f32.mrf.mxu1 }
  0xbf   :  { %1644 = vmatmul.msk.f32.gmra.mxu3 %vm40_vm0, %v2105_v24 }
  0xc0   :  { %1692 = vmatmul.msk.f32.gmra.mxu2 %vm40_vm0, %v2105_v24 }
  0xc1   :  { %1660 = vmatmul.msk.f32.gmra.mxu0 %vm40_vm0, %v2105_v24  ;;  %1676 = vmatmul.msk.f32.gmra.mxu1 %vm40_vm0, %v2105_v24 }
  0xc2   :  { %v219_v61 = vpop.f32.mrf.mxu3 }
  0xc3   :  { %v237_v62 = vmax.f32 %v2207_v39, %v219_v61  ;;  %v2284_v63 = vpop.f32.mrf.mxu2  ;;  %v222_v61 = vmax.f32 %v2147_v25, %v2149_v26  ;;  %v223_v25 = vmax.f32 %v2163_v29, %v2165_v30 }
  0xc6   :  { %v2286_v0 = vpop.f32.mrf.mxu0  ;;  %v2288_v1 = vpop.f32.mrf.mxu1 }
  0xc7   :  { %1645 = vmatmul.msk.f32.gmra.mxu3 %vm40_vm0, %v1916_v5 }
  0xc8   :  { %1693 = vmatmul.msk.f32.gmra.mxu2 %vm40_vm0, %v1916_v5 }
  0xc9   :  { %1661 = vmatmul.msk.f32.gmra.mxu0 %vm40_vm0, %v1916_v5  ;;  %1677 = vmatmul.msk.f32.gmra.mxu1 %vm40_vm0, %v1916_v5 }
  0xca   :  { %v294_v3 = vpop.f32.mrf.mxu3 }
  0xcb   :  { %v2304_v4 = vmax.f32 %v234_v45, %v294_v3  ;;  %v2306_v17 = vpop.f32.mrf.mxu2 }
  0xce   :  { %v2309_v19 = vpop.f32.mrf.mxu0  ;;  %v2311_v20 = vpop.f32.mrf.mxu1 }
  0xcf   :  { %1646 = vmatmul.msk.f32.gmra.mxu3 %vm40_vm0, %v1936_v7 }
  0xd0   :  { %1694 = vmatmul.msk.f32.gmra.mxu2 %vm40_vm0, %v1936_v7 }
  0xd1   :  { %1662 = vmatmul.msk.f32.gmra.mxu0 %vm40_vm0, %v1936_v7  ;;  %1678 = vmatmul.msk.f32.gmra.mxu1 %vm40_vm0, %v1936_v7 }
  0xd2   :  { %v297_v21 = vpop.f32.mrf.mxu3 }
  0xd3   :  { %v2321_v27 = vmax.f32 %v235_v51, %v297_v21  ;;  %v2323_v31 = vpop.f32.mrf.mxu2 }
  0xd6   :  { %v2325_v35 = vpop.f32.mrf.mxu0  ;;  %v2327_v39 = vpop.f32.mrf.mxu1 }
  0xd7   :  { %1647 = vmatmul.msk.f32.gmra.mxu3 %vm40_vm0, %v1956_v9 }
  0xd8   :  { %1695 = vmatmul.msk.f32.gmra.mxu2 %vm40_vm0, %v1956_v9 }
  0xd9   :  { %1663 = vmatmul.msk.f32.gmra.mxu0 %vm40_vm0, %v1956_v9  ;;  %1679 = vmatmul.msk.f32.gmra.mxu1 %vm40_vm0, %v1956_v9 }
  0xda   :  { %v300_v43 = vpop.f32.mrf.mxu3 }
  0xdb   :  { %v2337_v44 = vmax.f32 %v236_v57, %v300_v43  ;;  %v2339_v45 = vpop.f32.mrf.mxu2  ;;  %v306_v43 = vmax.f32 %v222_v61, %v2161_v28  ;;  %v307_v28 = vmax.f32 %v223_v25, %v2177_v32 }
  0xdd   :  { %3174 = vst [vmem:[#allocation7_spill] sm:$0xff] %v2337_v44 }
  0xde   :  { %v2341_v49 = vpop.f32.mrf.mxu0  ;;  %v2343_v50 = vpop.f32.mrf.mxu1 }
  0xdf   :  { %1648 = vmatmul.msk.f32.gmra.mxu3 %vm40_vm0, %v1974_v11 }
  0xe0   :  { %1696 = vmatmul.msk.f32.gmra.mxu2 %vm40_vm0, %v1974_v11 }
  0xe1   :  { %1664 = vmatmul.msk.f32.gmra.mxu0 %vm40_vm0, %v1974_v11  ;;  %1680 = vmatmul.msk.f32.gmra.mxu1 %vm40_vm0, %v1974_v11 }
  0xe2   :  { %v303_v51 = vpop.f32.mrf.mxu3 }
  0xe3   :  { %v2353_v56 = vmax.f32 %v237_v62, %v303_v51  ;;  %v2355_v57 = vpop.f32.mrf.mxu2 }
  0xe5   :  { %3175 = vst [vmem:[#allocation8_spill] sm:$0xff] %v2353_v56 }
  0xe6   :  { %v426_v3 = vpop.f32.mrf.mxu0  ;;  %v510_v21 = vpop.f32.mrf.mxu1 }
  0xe7   :  { %1697 = vmatmul.msk.f32.vlgmr.msra.gmra.mxu3 %vm40_vm0, %v1922_v6 }
  0xe8   :  { %1745 = vmatmul.msk.f32.vlgmr.msra.gmra.mxu2 %vm40_vm0, %v1922_v6 }
  0xe9   :  { %1713 = vmatmul.msk.f32.vlgmr.msra.gmra.mxu0 %vm40_vm0, %v1922_v6  ;;  %1729 = vmatmul.msk.f32.vlgmr.msra.gmra.mxu1 %vm40_vm0, %v1922_v6 }
  0xea   :  { %v342_v62 = vpop.f32.mrf.mxu3 }
  0xeb   :  { %v390_v51 = vmax.f32 %v306_v43, %v342_v62  ;;  %v594_v56 = vpop.f32.mrf.mxu2 }
  0xed   :  { %v474_v26 = vmax.f32 %v390_v51, %v426_v3 }
  0xee   :  { %v429_v11 = vpop.f32.mrf.mxu0  ;;  %v513_v44 = vpop.f32.mrf.mxu1 }
  0xef   :  { %v558_v9 = vmax.f32 %v474_v26, %v510_v21  ;;  %1698 = vmatmul.msk.f32.gmra.mxu3 %vm40_vm0, %v1941_v8  ;;  %v224_v21 = vmax.f32 %v2179_v33, %v2181_v34 }
  0xf0   :  { %1746 = vmatmul.msk.f32.gmra.mxu2 %vm40_vm0, %v1941_v8 }
  0xf1   :  { %v2375_v61 = vmax.f32 %v558_v9, %v594_v56  ;;  %1714 = vmatmul.msk.f32.gmra.mxu0 %vm40_vm0, %v1941_v8  ;;  %1730 = vmatmul.msk.f32.gmra.mxu1 %vm40_vm0, %v1941_v8  ;;  %v308_v9 = vmax.f32 %v224_v21, %v2193_v36  ;;  %v226_v21 = vmax.f32 %v2211_v41, %v2213_v42 }
  0xf2   :  { %v345_v29 = vpop.f32.mrf.mxu3 }
  0xf3   :  { %v391_v30 = vmax.f32 %v307_v28, %v345_v29  ;;  %v597_v3 = vpop.f32.mrf.mxu2 }
  0xf5   :  { %v475_v43 = vmax.f32 %v391_v30, %v429_v11 }
  0xf6   :  { %v432_v62 = vpop.f32.mrf.mxu0  ;;  %v516_v51 = vpop.f32.mrf.mxu1 }
  0xf7   :  { %v559_v26 = vmax.f32 %v475_v43, %v513_v44  ;;  %1699 = vmatmul.msk.f32.gmra.mxu3 %vm40_vm0, %v1961_v10  ;;  %v225_v44 = vmax.f32 %v2195_v37, %v2197_v38 }
  0xf8   :  { %1747 = vmatmul.msk.f32.gmra.mxu2 %vm40_vm0, %v1961_v10 }
  0xf9   :  { %v2388_v32 = vmax.f32 %v559_v26, %v597_v3  ;;  %1715 = vmatmul.msk.f32.gmra.mxu0 %vm40_vm0, %v1961_v10  ;;  %1731 = vmatmul.msk.f32.gmra.mxu1 %vm40_vm0, %v1961_v10  ;;  %v309_v36 = vmax.f32 %v225_v44, %v2209_v40  ;;  %v310_v40 = vmax.f32 %v226_v21, %v2228_v46 }
  0xfa   :  { %v348_v11 = vpop.f32.mrf.mxu3 }
  0xfb   :  { %v392_v33 = vmax.f32 %v308_v9, %v348_v11  ;;  %v600_v34 = vpop.f32.mrf.mxu2 }
  0xfd   :  { %v476_v56 = vmax.f32 %v392_v33, %v432_v62  ;;  %v227_v33 = vmax.f32 %v2231_v47, %v2233_v48 }
  0xfe   :  { %v435_v25 = vpop.f32.mrf.mxu0  ;;  %v519_v28 = vpop.f32.mrf.mxu1 }
  0xff   :  { %v560_v29 = vmax.f32 %v476_v56, %v516_v51  ;;  %1700 = vmatmul.msk.f32.gmra.mxu3 %vm40_vm0, %v1979_v12  ;;  %v311_v46 = vmax.f32 %v227_v33, %v2247_v52 }
 0x100   :  { %1748 = vmatmul.msk.f32.gmra.mxu2 %vm40_vm0, %v1979_v12 }
 0x101   :  { %v2401_v30 = vmax.f32 %v560_v29, %v600_v34  ;;  %1716 = vmatmul.msk.f32.gmra.mxu0 %vm40_vm0, %v1979_v12  ;;  %1732 = vmatmul.msk.f32.gmra.mxu1 %vm40_vm0, %v1979_v12 }
 0x102   :  { %v351_v37 = vpop.f32.mrf.mxu3 }
 0x103   :  { %v393_v38 = vmax.f32 %v309_v36, %v351_v37  ;;  %v603_v3 = vpop.f32.mrf.mxu2  ;;  %v228_v36 = vmax.f32 %v2256_v54, %v2258_v55 }
 0x105   :  { %v477_v43 = vmax.f32 %v393_v38, %v435_v25  ;;  %v312_v52 = vmax.f32 %v228_v36, %v2269_v58 }
 0x106   :  { %v438_v62 = vpop.f32.mrf.mxu0  ;;  %v522_v51 = vpop.f32.mrf.mxu1 }
 0x107   :  { %v561_v26 = vmax.f32 %v477_v43, %v519_v28  ;;  %1701 = vmatmul.msk.f32.gmra.mxu3 %vm40_vm0, %v1992_v13 }
 0x108   :  { %1749 = vmatmul.msk.f32.gmra.mxu2 %vm40_vm0, %v1992_v13 }
 0x109   :  { %v2414_v9 = vmax.f32 %v561_v26, %v603_v3  ;;  %1717 = vmatmul.msk.f32.gmra.mxu0 %vm40_vm0, %v1992_v13  ;;  %1733 = vmatmul.msk.f32.gmra.mxu1 %vm40_vm0, %v1992_v13 }
 0x10a   :  { %v354_v41 = vpop.f32.mrf.mxu3 }
 0x10b   :  { %v394_v42 = vmax.f32 %v310_v40, %v354_v41  ;;  %v606_v11 = vpop.f32.mrf.mxu2 }
 0x10d   :  { %v478_v34 = vmax.f32 %v394_v42, %v438_v62 }
 0x10e   :  { %v441_v44 = vpop.f32.mrf.mxu0  ;;  %v525_v56 = vpop.f32.mrf.mxu1 }
 0x10f   :  { %v562_v25 = vmax.f32 %v478_v34, %v522_v51  ;;  %1702 = vmatmul.msk.f32.gmra.mxu3 %vm40_vm0, %v2005_v14  ;;  %v229_v51 = vmax.f32 %v2271_v59, %v2273_v60  ;;  %v230_v34 = vmax.f32 %v2286_v0, %v2288_v1  ;;  %v996_v0 = vld [vmem:[%s3153_s0 + $0x68] sm:$0xff] }
 0x110   :  { %1750 = vmatmul.msk.f32.gmra.mxu2 %vm40_vm0, %v2005_v14  ;;  %1010 = vmatpush.msrb.mxu3 %v996_v0 }
 0x111   :  { %v2427_v28 = vmax.f32 %v562_v25, %v606_v11  ;;  %1718 = vmatmul.msk.f32.gmra.mxu0 %vm40_vm0, %v2005_v14  ;;  %1734 = vmatmul.msk.f32.gmra.mxu1 %vm40_vm0, %v2005_v14  ;;  %v313_v58 = vmax.f32 %v229_v51, %v2284_v63  ;;  %v314_v63 = vmax.f32 %v230_v34, %v2306_v17  ;;  %v1261_v51 = vld [vmem:[%s3155_s2 + $0x78] sm:$0xff] }
 0x112   :  { %v357_v47 = vpop.f32.mrf.mxu3  ;;  %1011 = vmatpush.msrb.mxu3 %v2295_v2  ;;  %v231_v17 = vmax.f32 %v2309_v19, %v2311_v20 }
 0x113   :  { %v395_v48 = vmax.f32 %v311_v46, %v357_v47  ;;  %v609_v29 = vpop.f32.mrf.mxu2 }
 0x114   :  { %1012 = vmatpush.msrb.mxu3 %v2252_v53  ;;  %v1080_v53 = vld [vmem:[%s3153_s0 + $0x70] sm:$0xff] }
 0x115   :  { %v479_v37 = vmax.f32 %v395_v48, %v441_v44  ;;  %1094 = vmatpush.msrb.mxu0 %v1080_v53 }
 0x116   :  { %v444_v38 = vpop.f32.mrf.mxu0  ;;  %v528_v3 = vpop.f32.mrf.mxu1 }
 0x117   :  { %v563_v21 = vmax.f32 %v479_v37, %v525_v56  ;;  %1703 = vmatmul.msk.f32.gmra.mxu3 %vm40_vm0, %v2018_v15  ;;  %1095 = vmatpush.msrb.mxu0 %v996_v0 }
 0x118   :  { %1751 = vmatmul.msk.f32.gmra.mxu2 %vm40_vm0, %v2018_v15 }
 0x119   :  { %v2440_v43 = vmax.f32 %v563_v21, %v609_v29  ;;  %1719 = vmatmul.msk.f32.gmra.mxu0 %vm40_vm0, %v2018_v15  ;;  %1735 = vmatmul.msk.f32.gmra.mxu1 %vm40_vm0, %v2018_v15  ;;  %v315_v21 = vmax.f32 %v231_v17, %v2323_v31  ;;  %v232_v31 = vmax.f32 %v2325_v35, %v2327_v39 }
 0x11a   :  { %v360_v54 = vpop.f32.mrf.mxu3  ;;  %1096 = vmatpush.msrb.mxu0 %v2295_v2 }
 0x11b   :  { %v396_v55 = vmax.f32 %v312_v52, %v360_v54  ;;  %v612_v62 = vpop.f32.mrf.mxu2  ;;  %v1164_v54 = vld [vmem:[%s3153_s0 + $0x78] sm:$0xff]  ;;  %v316_v35 = vmax.f32 %v232_v31, %v2339_v45  ;;  %v1260_v45 = vld [vmem:[%s3155_s2 + $0x70] sm:$0xff]  ;;  %s1573_s0 = sshll.u32 %s3158_s5, 4  ;;  %s1574_s0 = int_to_ptr.hbm [resolvable:$true] %s1573_s0 }
 0x11c   :  { %1178 = vmatpush.msrb.mxu1 %v1164_v54 }
 0x11d   :  { %v480_v26 = vmax.f32 %v396_v55, %v444_v38 }
 0x11e   :  { %v447_v40 = vpop.f32.mrf.mxu0  ;;  %v531_v41 = vpop.f32.mrf.mxu1  ;;  %1179 = vmatpush.msrb.mxu1 %v1080_v53 }
 0x11f   :  { %v564_v42 = vmax.f32 %v480_v26, %v528_v3  ;;  %1704 = vmatmul.msk.f32.gmra.mxu3 %vm40_vm0, %v2031_v16 }
 0x120   :  { %1752 = vmatmul.msk.f32.gmra.mxu2 %vm40_vm0, %v2031_v16  ;;  %1180 = vmatpush.msrb.mxu1 %v996_v0 }
 0x121   :  { %v2453_v11 = vmax.f32 %v564_v42, %v612_v62  ;;  %1720 = vmatmul.msk.f32.gmra.mxu0 %vm40_vm0, %v2031_v16  ;;  %1736 = vmatmul.msk.f32.gmra.mxu1 %vm40_vm0, %v2031_v16  ;;  %v1858_v62 = vmov 0  }
 0x122   :  { %v363_v59 = vpop.f32.mrf.mxu3  ;;  %1822 = vset.pattern.permute.xlu0 %v1858_v62  ;;  %1823 = vset.pattern.permute.xlu1 %v1858_v62 }
 0x123   :  { %v397_v60 = vmax.f32 %v313_v58, %v363_v59  ;;  %v615_v33 = vpop.f32.mrf.mxu2  ;;  %1339 = vperm.xlu0 %1822, %v1261_v51   ;;  %1824 = vset.pattern.permute.xlu2 %v1858_v62  ;;  %v233_v58 = vmax.f32 %v2341_v49, %v2343_v50  ;;  %v1258_v62 = vld [vmem:[%s3155_s2 + $0x60] sm:$0xff]  ;;  %v1249_v51 = vld [vmem:[%s3155_s2 + $0x18] sm:$0xff] }
 0x125   :  { %v481_v44 = vmax.f32 %v397_v60, %v447_v40  ;;  %v317_v49 = vmax.f32 %v233_v58, %v2355_v57 }
 0x126   :  { %v450_v56 = vpop.f32.mrf.mxu0  ;;  %v2461_v25 = vpop.f32.mrf.mxu1 }
 0x127   :  { %v565_v46 = vmax.f32 %v481_v44, %v531_v41  ;;  %1705 = vmatmul.msk.f32.gmra.mxu3 %vm40_vm0, %v2049_v18 }
 0x128   :  { %1753 = vmatmul.msk.f32.gmra.mxu2 %vm40_vm0, %v2049_v18 }
 0x129   :  { %v2468_v47 = vmax.f32 %v565_v46, %v615_v33  ;;  %1721 = vmatmul.msk.f32.gmra.mxu0 %vm40_vm0, %v2049_v18  ;;  %1737 = vmatmul.msk.f32.gmra.mxu1 %vm40_vm0, %v2049_v18  ;;  %v1255_v46 = vld [vmem:[%s3155_s2 + $0x48] sm:$0xff] }
 0x12a   :  { %v366_v1 = vpop.f32.mrf.mxu3 }
 0x12b   :  { %v398_v48 = vmax.f32 %v314_v63, %v366_v1  ;;  %v2477_v29 = vpop.f32.mrf.mxu2  ;;  %1334 = vperm.xlu0 %1822, %v1260_v45  }
 0x12d   :  { %v2482_v36 = vmax.f32 %v398_v48, %v450_v56 }
 0x12e   :  { %v453_v37 = vpop.f32.mrf.mxu0  ;;  %v2484_v38 = vpop.f32.mrf.mxu1 }
 0x12f   :  { %v566_v3 = vmax.f32 %v2482_v36, %v2461_v25  ;;  %1706 = vmatmul.msk.f32.gmra.mxu3 %vm40_vm0, %v2079_v22 }
 0x130   :  { %1754 = vmatmul.msk.f32.gmra.mxu2 %vm40_vm0, %v2079_v22 }
 0x131   :  { %1722 = vmatmul.msk.f32.gmra.mxu0 %vm40_vm0, %v2079_v22  ;;  %1738 = vmatmul.msk.f32.gmra.mxu1 %vm40_vm0, %v2079_v22 }
 0x132   :  { %v369_v19 = vpop.f32.mrf.mxu3 }
 0x133   :  { %v399_v20 = vmax.f32 %v315_v21, %v369_v19  ;;  %v2501_v52 = vpop.f32.mrf.mxu2  ;;  %1309 = vperm.xlu0 %1822, %v1255_v46   ;;  %v1252_v21 = vld [vmem:[%s3155_s2 + $0x30] sm:$0xff] }
 0x135   :  { %v2508_v55 = vmax.f32 %v399_v20, %v453_v37  ;;  %v1259_v37 = vld [vmem:[%s3155_s2 + $0x68] sm:$0xff] }
 0x136   :  { %v456_v26 = vpop.f32.mrf.mxu0  ;;  %v2513_v40 = vpop.f32.mrf.mxu1  ;;  %1329 = vperm.xlu1 %1823, %v1259_v37  }
 0x137   :  { %v567_v41 = vmax.f32 %v2508_v55, %v2484_v38  ;;  %1707 = vmatmul.msk.f32.gmra.mxu3 %vm40_vm0, %v2092_v23 }
 0x138   :  { %1755 = vmatmul.msk.f32.gmra.mxu2 %vm40_vm0, %v2092_v23 }
 0x139   :  { %1723 = vmatmul.msk.f32.gmra.mxu0 %vm40_vm0, %v2092_v23  ;;  %1739 = vmatmul.msk.f32.gmra.mxu1 %vm40_vm0, %v2092_v23 }
 0x13a   :  { %v372_v2 = vpop.f32.mrf.mxu3 }
 0x13b   :  { %v400_v39 = vmax.f32 %v316_v35, %v372_v2  ;;  %v2527_v42 = vpop.f32.mrf.mxu2  ;;  %1294 = vperm.xlu0 %1822, %v1252_v21   ;;  %v3179_v21 = vld [vmem:[#allocation8_spill] sm:$0xff] }
 0x13d   :  { %v2531_v59 = vmax.f32 %v400_v39, %v456_v26  ;;  %v3177_v39 = vld [vmem:[#allocation7_spill] sm:$0xff] }
 0x13e   :  { %v459_v60 = vpop.f32.mrf.mxu0  ;;  %v2536_v33 = vpop.f32.mrf.mxu1  ;;  %1324 = vperm.xlu1 %1823, %v1258_v62   ;;  %v1256_v62 = vld [vmem:[%s3155_s2 + $0x50] sm:$0xff] }
 0x13f   :  { %v568_v23 = vmax.f32 %v2531_v59, %v2513_v40  ;;  %1708 = vmatmul.msk.f32.gmra.mxu3 %vm40_vm0, %v2105_v24  ;;  %v1399_v59 = vld [vmem:[%s3157_s4 + $0x48] sm:$0xff] }
 0x140   :  { %1756 = vmatmul.msk.f32.gmra.mxu2 %vm40_vm0, %v2105_v24 }
 0x141   :  { %1724 = vmatmul.msk.f32.gmra.mxu0 %vm40_vm0, %v2105_v24  ;;  %1740 = vmatmul.msk.f32.gmra.mxu1 %vm40_vm0, %v2105_v24 }
 0x142   :  { %v375_v50 = vpop.f32.mrf.mxu3 }
 0x143   :  { %v401_v34 = vmax.f32 %v317_v49, %v375_v50  ;;  %v2549_v44 = vpop.f32.mrf.mxu2  ;;  %1279 = vperm.xlu0 %1822, %v1249_v51   ;;  %v1257_v49 = vld [vmem:[%s3155_s2 + $0x58] sm:$0xff]  ;;  %v1254_v50 = vld [vmem:[%s3155_s2 + $0x40] sm:$0xff]  ;;  %v1251_v51 = vld [vmem:[%s3155_s2 + $0x28] sm:$0xff] }
 0x144   :  { %1319 = vperm.xlu2 %1824, %v1257_v49  }
 0x145   :  { %v2551_v56 = vmax.f32 %v401_v34, %v459_v60  ;;  %v1246_v34 = vld [vmem:[%s3155_s2] sm:$0xff] }
 0x146   :  { %v462_v63 = vpop.f32.mrf.mxu0  ;;  %v2556_v0 = vpop.f32.mrf.mxu1  ;;  %1304 = vperm.xlu1 %1823, %v1254_v50  }
 0x147   :  { %v569_v57 = vmax.f32 %v2551_v56, %v2536_v33  ;;  %1709 = vmatmul.msk.f32.gmra.mxu3 %vm40_vm0, %v1916_v5  ;;  %v1402_v56 = vld [vmem:[%s3157_s4 + $0x60] sm:$0xff] }
 0x148   :  { %1757 = vmatmul.msk.f32.gmra.mxu2 %vm40_vm0, %v1916_v5 }
 0x149   :  { %1725 = vmatmul.msk.f32.gmra.mxu0 %vm40_vm0, %v1916_v5  ;;  %1741 = vmatmul.msk.f32.gmra.mxu1 %vm40_vm0, %v1916_v5 }
 0x14a   :  { %v378_v24 = vpop.f32.mrf.mxu3 }
 0x14b   :  { %v402_v1 = vmax.f32 %v2304_v4, %v378_v24  ;;  %v2569_v48 = vpop.f32.mrf.mxu2  ;;  %1264 = vperm.xlu0 %1822, %v1246_v34   ;;  %v1253_v34 = vld [vmem:[%s3155_s2 + $0x38] sm:$0xff] }
 0x14c   :  { %1314 = vperm.xlu2 %1824, %v1256_v62  }
 0x14d   :  { %v2571_v17 = vmax.f32 %v402_v1, %v462_v63  ;;  %v3178_v1 = vld [vmem:[#allocation6_spill] sm:$0xff] }
 0x14e   :  { %v465_v53 = vpop.f32.mrf.mxu0  ;;  %v2579_v19 = vpop.f32.mrf.mxu1  ;;  %1289 = vperm.xlu1 %1823, %v1251_v51   ;;  %v1250_v51 = vld [vmem:[%s3155_s2 + $0x20] sm:$0xff] }
 0x14f   :  { %1710 = vmatmul.msk.f32.gmra.mxu3 %vm40_vm0, %v1936_v7 }
 0x150   :  { %1758 = vmatmul.msk.f32.gmra.mxu2 %vm40_vm0, %v1936_v7 }
 0x151   :  { %1726 = vmatmul.msk.f32.gmra.mxu0 %vm40_vm0, %v1936_v7  ;;  %1742 = vmatmul.msk.f32.gmra.mxu1 %vm40_vm0, %v1936_v7  ;;  %v1390_v7 = vld [vmem:[%s3157_s4] sm:$0xff] }
 0x152   :  { %v381_v4 = vpop.f32.mrf.mxu3 }
 0x153   :  { %v403_v20 = vmax.f32 %v2321_v27, %v381_v4  ;;  %v2592_v54 = vpop.f32.mrf.mxu2  ;;  %v3176_v27 = vld [vmem:[#allocation5_spill] sm:$0xff] }
 0x154   :  { %1299 = vperm.xlu2 %1824, %v1253_v34  }
 0x155   :  { %v2594_v31 = vmax.f32 %v403_v20, %v465_v53 }
 0x156   :  { %v468_v26 = vpop.f32.mrf.mxu0  ;;  %v2602_v35 = vpop.f32.mrf.mxu1 }
 0x157   :  { %1711 = vmatmul.msk.f32.gmra.mxu3 %vm40_vm0, %v3176_v27 }
 0x158   :  { %1759 = vmatmul.msk.f32.gmra.mxu2 %vm40_vm0, %v3176_v27 }
 0x159   :  { %1727 = vmatmul.msk.f32.gmra.mxu0 %vm40_vm0, %v3176_v27  ;;  %1743 = vmatmul.msk.f32.gmra.mxu1 %vm40_vm0, %v3176_v27 }
 0x15a   :  { %v384_v2 = vpop.f32.mrf.mxu3 }
 0x15b   :  { %v404_v58 = vmax.f32 %v3177_v39, %v384_v2  ;;  %v2615_v45 = vpop.f32.mrf.mxu2 }
 0x15c   :  { %1284 = vperm.xlu2 %1824, %v1250_v51  }
 0x15d   :  { %v2617_v60 = vmax.f32 %v404_v58, %v468_v26 }
 0x15e   :  { %v471_v46 = vpop.f32.mrf.mxu0  ;;  %v2628_v63 = vpop.f32.mrf.mxu1 }
 0x15f   :  { %1712 = vmatmul.msk.f32.gmra.mxu3 %vm40_vm0, %v3178_v1 }
 0x160   :  { %1760 = vmatmul.msk.f32.gmra.mxu2 %vm40_vm0, %v3178_v1 }
 0x161   :  { %1728 = vmatmul.msk.f32.gmra.mxu0 %vm40_vm0, %v3178_v1  ;;  %1744 = vmatmul.msk.f32.gmra.mxu1 %vm40_vm0, %v3178_v1 }
 0x162   :  { %v387_v37 = vpop.f32.mrf.mxu3 }
 0x163   :  { %v405_v53 = vmax.f32 %v3179_v21, %v387_v37  ;;  %v2641_v4 = vpop.f32.mrf.mxu2 }
 0x165   :  { %v2643_v20 = vmax.f32 %v405_v53, %v471_v46  ;;  %v1248_v46 = vld [vmem:[%s3155_s2 + $0x10] sm:$0xff] }
 0x166   :  { %v762_v26 = vpop.f32.mrf.mxu0  ;;  %v2651_v27 = vpop.f32.mrf.mxu1  ;;  %1274 = vperm.xlu1 %1823, %v1248_v46  }
 0x167   :  { %1761 = vmatmul.msk.f32.vlgmr.msrb.gmra.mxu3 %vm40_vm0, %v1922_v6 }
 0x169   :  { %1777 = vmatmul.msk.f32.vlgmr.msrb.gmra.mxu0 %vm40_vm0, %v1922_v6  ;;  %1793 = vmatmul.msk.f32.vlgmr.msrb.gmra.mxu1 %vm40_vm0, %v1922_v6 }
 0x16a   :  { %v678_v39 = vpop.f32.mrf.mxu3 }
 0x16b   :  { %v726_v58 = vmax.f32 %v2375_v61, %v678_v39  ;;  %v2662_v49 = vpop.f32.mrf.mxu2 }
 0x16d   :  { %v2664_v50 = vmax.f32 %v726_v58, %v762_v26 }
 0x16e   :  { %v765_v1 = vpop.f32.mrf.mxu0  ;;  %v2672_v37 = vpop.f32.mrf.mxu1  ;;  %1408 = vperm.xlu1 %1823, %v1390_v7  }
 0x16f   :  { %1762 = vmatmul.msk.f32.gmra.mxu3 %vm40_vm0, %v1941_v8 }
 0x171   :  { %1778 = vmatmul.msk.f32.gmra.mxu0 %vm40_vm0, %v1941_v8  ;;  %1794 = vmatmul.msk.f32.gmra.mxu1 %vm40_vm0, %v1941_v8 }
 0x172   :  { %v681_v61 = vpop.f32.mrf.mxu3 }
 0x173   :  { %v727_v21 = vmax.f32 %v2388_v32, %v681_v61  ;;  %v2683_v53 = vpop.f32.mrf.mxu2 }
 0x175   :  { %v2685_v62 = vmax.f32 %v727_v21, %v765_v1  ;;  %v1247_v1 = vld [vmem:[%s3155_s2 + $0x8] sm:$0xff] }
 0x176   :  { %v768_v26 = vpop.f32.mrf.mxu0  ;;  %v2690_v39 = vpop.f32.mrf.mxu1  ;;  %1269 = vperm.xlu2 %1824, %v1247_v1  }
 0x177   :  { %1763 = vmatmul.msk.f32.gmra.mxu3 %vm40_vm0, %v1961_v10 }
 0x179   :  { %1779 = vmatmul.msk.f32.gmra.mxu0 %vm40_vm0, %v1961_v10  ;;  %1795 = vmatmul.msk.f32.gmra.mxu1 %vm40_vm0, %v1961_v10 }
 0x17a   :  { %v684_v8 = vpop.f32.mrf.mxu3 }
 0x17b   :  { %v728_v32 = vmax.f32 %v2401_v30, %v684_v8  ;;  %v2701_v34 = vpop.f32.mrf.mxu2 }
 0x17d   :  { %v2703_v46 = vmax.f32 %v728_v32, %v768_v26 }
 0x17e   :  { %v771_v61 = vpop.f32.mrf.mxu0  ;;  %v2708_v21 = vpop.f32.mrf.mxu1 }
 0x17f   :  { %1764 = vmatmul.msk.f32.gmra.mxu3 %vm40_vm0, %v1979_v12 }
 0x181   :  { %1780 = vmatmul.msk.f32.gmra.mxu0 %vm40_vm0, %v1979_v12  ;;  %1796 = vmatmul.msk.f32.gmra.mxu1 %vm40_vm0, %v1979_v12 }
 0x182   :  { %v687_v10 = vpop.f32.mrf.mxu3 }
 0x183   :  { %v729_v30 = vmax.f32 %v2414_v9, %v687_v10  ;;  %v2719_v26 = vpop.f32.mrf.mxu2 }
 0x185   :  { %v2721_v8 = vmax.f32 %v729_v30, %v771_v61 }
 0x186   :  { %v774_v32 = vpop.f32.mrf.mxu0  ;;  %v2723_v1 = vpop.f32.mrf.mxu1 }
 0x187   :  { %1765 = vmatmul.msk.f32.gmra.mxu3 %vm40_vm0, %v1992_v13 }
 0x189   :  { %1781 = vmatmul.msk.f32.gmra.mxu0 %vm40_vm0, %v1992_v13  ;;  %1797 = vmatmul.msk.f32.gmra.mxu1 %vm40_vm0, %v1992_v13 }
 0x18a   :  { %v690_v12 = vpop.f32.mrf.mxu3 }
 0x18b   :  { %v730_v9 = vmax.f32 %v2427_v28, %v690_v12  ;;  %v2734_v61 = vpop.f32.mrf.mxu2 }
 0x18d   :  { %v2736_v10 = vmax.f32 %v730_v9, %v774_v32 }
 0x18e   :  { %v777_v30 = vpop.f32.mrf.mxu0  ;;  %v2738_v58 = vpop.f32.mrf.mxu1 }
 0x18f   :  { %1766 = vmatmul.msk.f32.gmra.mxu3 %vm40_vm0, %v2005_v14 }
 0x191   :  { %1782 = vmatmul.msk.f32.gmra.mxu0 %vm40_vm0, %v2005_v14  ;;  %1798 = vmatmul.msk.f32.gmra.mxu1 %vm40_vm0, %v2005_v14 }
 0x192   :  { %v693_v13 = vpop.f32.mrf.mxu3 }
 0x193   :  { %v731_v28 = vmax.f32 %v2440_v43, %v693_v13  ;;  %v2749_v32 = vpop.f32.mrf.mxu2 }
 0x195   :  { %v2751_v12 = vmax.f32 %v731_v28, %v777_v30 }
 0x196   :  { %v780_v9 = vpop.f32.mrf.mxu0  ;;  %v2753_v6 = vpop.f32.mrf.mxu1 }
 0x197   :  { %1767 = vmatmul.msk.f32.gmra.mxu3 %vm40_vm0, %v2018_v15 }
 0x199   :  { %1783 = vmatmul.msk.f32.gmra.mxu0 %vm40_vm0, %v2018_v15  ;;  %1799 = vmatmul.msk.f32.gmra.mxu1 %vm40_vm0, %v2018_v15 }
 0x19a   :  { %v696_v14 = vpop.f32.mrf.mxu3 }
 0x19b   :  { %v732_v43 = vmax.f32 %v2453_v11, %v696_v14  ;;  %v2764_v30 = vpop.f32.mrf.mxu2 }
 0x19d   :  { %v2766_v13 = vmax.f32 %v732_v43, %v780_v9 }
 0x19e   :  { %v783_v28 = vpop.f32.mrf.mxu0  ;;  %v2768_v2 = vpop.f32.mrf.mxu1 }
 0x19f   :  { %1768 = vmatmul.msk.f32.gmra.mxu3 %vm40_vm0, %v2031_v16 }
 0x1a1   :  { %1784 = vmatmul.msk.f32.gmra.mxu0 %vm40_vm0, %v2031_v16  ;;  %1800 = vmatmul.msk.f32.gmra.mxu1 %vm40_vm0, %v2031_v16  ;;  %v650_v16 = vmax.f32 %v566_v3, %v2477_v29  ;;  %v651_v29 = vmax.f32 %v567_v41, %v2501_v52  ;;  %v1825_v3 = vld [vmem:[%s3154_s1 + $0x48] sm:$0xff]  ;;  %v1826_v41 = vld [vmem:[%s3154_s1 + $0x50] sm:$0xff] }
 0x1a2   :  { %v699_v15 = vpop.f32.mrf.mxu3 }
 0x1a3   :  { %v733_v11 = vmax.f32 %v2468_v47, %v699_v15  ;;  %v2779_v9 = vpop.f32.mrf.mxu2  ;;  %v1392_v15 = vld [vmem:[%s3157_s4 + $0x10] sm:$0xff] }
 0x1a4   :  { %1418 = vperm.xlu0 %1822, %v1392_v15  }
 0x1a5   :  { %v2781_v14 = vmax.f32 %v733_v11, %v783_v28 }
 0x1a6   :  { %v786_v43 = vpop.f32.mrf.mxu0  ;;  %v870_v24 = vpop.f32.mrf.mxu1 }
 0x1a7   :  { %1769 = vmatmul.msk.f32.gmra.mxu3 %vm40_vm0, %v2049_v18 }
 0x1a9   :  { %1785 = vmatmul.msk.f32.gmra.mxu0 %vm40_vm0, %v2049_v18  ;;  %1801 = vmatmul.msk.f32.gmra.mxu1 %vm40_vm0, %v2049_v18  ;;  %v1393_v18 = vld [vmem:[%s3157_s4 + $0x18] sm:$0xff] }
 0x1aa   :  { %v702_v47 = vpop.f32.mrf.mxu3  ;;  %1423 = vperm.xlu1 %1823, %v1393_v18  }
 0x1ab   :  { %v734_v28 = vmax.f32 %v650_v16, %v702_v47  ;;  %v954_v7 = vpop.f32.mrf.mxu2  ;;  %v1396_v47 = vld [vmem:[%s3157_s4 + $0x30] sm:$0xff] }
 0x1ad   :  { %v818_v11 = vmax.f32 %v734_v28, %v786_v43  ;;  %v1395_v43 = vld [vmem:[%s3157_s4 + $0x28] sm:$0xff] }
 0x1ae   :  { %v789_v51 = vpop.f32.mrf.mxu0  ;;  %v2801_v5 = vpop.f32.mrf.mxu1  ;;  %1433 = vperm.xlu0 %1822, %v1395_v43  }
 0x1af   :  { %v902_v25 = vmax.f32 %v818_v11, %v870_v24  ;;  %1770 = vmatmul.msk.f32.gmra.mxu3 %vm40_vm0, %v2079_v22  ;;  %v1398_v11 = vld [vmem:[%s3157_s4 + $0x40] sm:$0xff] }
 0x1b1   :  { %v2812_v36 = vmax.f32 %v902_v25, %v954_v7  ;;  %1786 = vmatmul.msk.f32.gmra.mxu0 %vm40_vm0, %v1825_v3  ;;  %1802 = vmatmul.msk.f32.gmra.mxu1 %vm40_vm0, %v1825_v3 }
 0x1b2   :  { %v705_v22 = vpop.f32.mrf.mxu3  ;;  %1438 = vperm.xlu1 %1823, %v1396_v47   ;;  %v1391_v47 = vld [vmem:[%s3157_s4 + $0x8] sm:$0xff] }
 0x1b3   :  { %v735_v24 = vmax.f32 %v651_v29, %v705_v22  ;;  %v1401_v22 = vld [vmem:[%s3157_s4 + $0x58] sm:$0xff]  ;;  %1413 = vperm.xlu2 %1824, %v1391_v47  }
 0x1b5   :  { %v2822_v16 = vmax.f32 %v735_v24, %v789_v51  ;;  %v652_v51 = vmax.f32 %v568_v23, %v2527_v42  ;;  %v1827_v42 = vld [vmem:[%s3154_s1 + $0x58] sm:$0xff]  ;;  %v653_v23 = vmax.f32 %v569_v57, %v2549_v44  ;;  %v1828_v44 = vld [vmem:[%s3154_s1 + $0x60] sm:$0xff]  ;;  %v3180_v57 = vmax.f32 %v2571_v17, %v2556_v0 }
 0x1b6   :  { %v792_v38 = vpop.f32.mrf.mxu0  ;;  %v2824_v52 = vpop.f32.mrf.mxu1  ;;  %1448 = vperm.xlu0 %1822, %v1398_v11  }
 0x1b7   :  { %1771 = vmatmul.msk.f32.gmra.mxu3 %vm40_vm0, %v1826_v41 }
 0x1b9   :  { %1787 = vmatmul.msk.f32.gmra.mxu0 %vm40_vm0, %v1826_v41  ;;  %1803 = vmatmul.msk.f32.gmra.mxu1 %vm40_vm0, %v1826_v41  ;;  %v654_v41 = vmax.f32 %v3180_v57, %v2569_v48 }
 0x1ba   :  { %v708_v28 = vpop.f32.mrf.mxu3  ;;  %1453 = vperm.xlu1 %1823, %v1399_v59   ;;  %v3181_v59 = vmax.f32 %v2594_v31, %v2579_v19  ;;  %v3182_v31 = vmax.f32 %v2617_v60, %v2602_v35  ;;  %v3183_v60 = vmax.f32 %v2643_v20, %v2628_v63 }
 0x1bb   :  { %v736_v15 = vmax.f32 %v652_v51, %v708_v28 }
 0x1bc   :  { %v656_v57 = vmax.f32 %v3182_v31, %v2615_v45  ;;  %v1831_v45 = vld [vmem:[%s3154_s1 + $0x78] sm:$0xff] }
 0x1bd   :  { %v2844_v7 = vmax.f32 %v736_v15, %v792_v38  ;;  %v1404_v15 = vld [vmem:[%s3157_s4 + $0x70] sm:$0xff] }
 0x1be   :  { %v795_v25 = vpop.f32.mrf.mxu0  ;;  %v2846_v18 = vpop.f32.mrf.mxu1  ;;  %1463 = vperm.xlu0 %1822, %v1401_v22  }
 0x1bf   :  { %1772 = vmatmul.msk.f32.gmra.mxu3 %vm40_vm0, %v1827_v42 }
 0x1c1   :  { %1788 = vmatmul.msk.f32.gmra.mxu0 %vm40_vm0, %v1827_v42  ;;  %1804 = vmatmul.msk.f32.gmra.mxu1 %vm40_vm0, %v1827_v42  ;;  %v1405_v42 = vld [vmem:[%s3157_s4 + $0x78] sm:$0xff] }
 0x1c2   :  { %v711_v29 = vpop.f32.mrf.mxu3  ;;  %1468 = vperm.xlu1 %1823, %v1402_v56  }
 0x1c3   :  { %v737_v3 = vmax.f32 %v653_v23, %v711_v29  ;;  %v655_v23 = vmax.f32 %v3181_v59, %v2592_v54  ;;  %v1394_v29 = vld [vmem:[%s3157_s4 + $0x20] sm:$0xff]  ;;  %v1830_v54 = vld [vmem:[%s3154_s1 + $0x70] sm:$0xff] }
 0x1c4   :  { %1428 = vperm.xlu2 %1824, %v1394_v29  }
 0x1c5   :  { %v2866_v24 = vmax.f32 %v737_v3, %v795_v25  ;;  %v1829_v25 = vld [vmem:[%s3154_s1 + $0x68] sm:$0xff] }
 0x1c6   :  { %v798_v43 = vpop.f32.mrf.mxu0  ;;  %v2868_v38 = vpop.f32.mrf.mxu1  ;;  %1478 = vperm.xlu0 %1822, %v1404_v15  }
 0x1c7   :  { %1773 = vmatmul.msk.f32.gmra.mxu3 %vm40_vm0, %v1828_v44 }
 0x1c9   :  { %1789 = vmatmul.msk.f32.gmra.mxu0 %vm40_vm0, %v1828_v44  ;;  %1805 = vmatmul.msk.f32.gmra.mxu1 %vm40_vm0, %v1828_v44 }
 0x1ca   :  { %v714_v51 = vpop.f32.mrf.mxu3  ;;  %1483 = vperm.xlu1 %1823, %v1405_v42   ;;  %v1400_v42 = vld [vmem:[%s3157_s4 + $0x50] sm:$0xff] }
 0x1cb   :  { %v738_v28 = vmax.f32 %v654_v41, %v714_v51  ;;  %v1397_v41 = vld [vmem:[%s3157_s4 + $0x38] sm:$0xff] }
 0x1cc   :  { %1443 = vperm.xlu2 %1824, %v1397_v41  }
 0x1cd   :  { %v2891_v11 = vmax.f32 %v738_v28, %v798_v43 }
 0x1ce   :  { %v801_v0 = vpop.f32.mrf.mxu0  ;;  %v2893_v48 = vpop.f32.mrf.mxu1 }
 0x1cf   :  { %1774 = vmatmul.msk.f32.gmra.mxu3 %vm40_vm0, %v1829_v25 }
 0x1d1   :  { %1790 = vmatmul.msk.f32.gmra.mxu0 %vm40_vm0, %v1829_v25  ;;  %1806 = vmatmul.msk.f32.gmra.mxu1 %vm40_vm0, %v1829_v25  ;;  %v657_v25 = vmax.f32 %v3183_v60, %v2641_v4  ;;  %v3185_v4 = vmax.f32 %v2664_v50, %v2651_v27  ;;  %v3188_v27 = vmax.f32 %v2685_v62, %v2672_v37  ;;  %v1340_v62 = vpop.permute.xlu0 %1339 }
 0x1d2   :  { %v717_v3 = vpop.f32.mrf.mxu3 }
 0x1d3   :  { %v739_v22 = vmax.f32 %v655_v23, %v717_v3  ;;  %v978_v20 = vmax.f32 %v3185_v4, %v2662_v49  ;;  %v979_v49 = vmax.f32 %v3188_v27, %v2683_v53 }
 0x1d4   :  { %1458 = vperm.xlu2 %1824, %v1400_v42  }
 0x1d5   :  { %v2913_v43 = vmax.f32 %v739_v22, %v801_v0 }
 0x1d6   :  { %v804_v44 = vpop.f32.mrf.mxu0  ;;  %v2915_v56 = vpop.f32.mrf.mxu1 }
 0x1d7   :  { %v907_v19 = vmax.f32 %v2913_v43, %v2893_v48  ;;  %1775 = vmatmul.msk.f32.gmra.mxu3 %vm40_vm0, %v1830_v54 }
 0x1d9   :  { %1791 = vmatmul.msk.f32.gmra.mxu0 %vm40_vm0, %v1830_v54  ;;  %1807 = vmatmul.msk.f32.gmra.mxu1 %vm40_vm0, %v1830_v54  ;;  %v1335_v55 = vpop.permute.xlu0 %1334 }
 0x1da   :  { %v720_v47 = vpop.f32.mrf.mxu3 }
 0x1db   :  { %v740_v51 = vmax.f32 %v656_v57, %v720_v47 }
 0x1dd   :  { %v2932_v28 = vmax.f32 %v740_v51, %v804_v44  ;;  %v1403_v44 = vld [vmem:[%s3157_s4 + $0x68] sm:$0xff] }
 0x1de   :  { %v807_v15 = vpop.f32.mrf.mxu0  ;;  %v2934_v0 = vpop.f32.mrf.mxu1  ;;  %1473 = vperm.xlu2 %1824, %v1403_v44   ;;  %v3194_v44 = vmax.f32 %v2721_v8, %v2708_v21 }
 0x1df   :  { %v908_v35 = vmax.f32 %v2932_v28, %v2915_v56  ;;  %1776 = vmatmul.msk.f32.gmra.mxu3 %vm40_vm0, %v1831_v45 }
 0x1e1   :  { %1792 = vmatmul.msk.f32.gmra.mxu0 %vm40_vm0, %v1831_v45  ;;  %1808 = vmatmul.msk.f32.gmra.mxu1 %vm40_vm0, %v1831_v45 }
 0x1e2   :  { %v723_v59 = vpop.f32.mrf.mxu3 }
 0x1e3   :  { %v741_v23 = vmax.f32 %v657_v25, %v723_v59  ;;  %v3191_v59 = vmax.f32 %v2703_v46, %v2690_v39 }
 0x1e5   :  { %v2951_v29 = vmax.f32 %v741_v23, %v807_v15  ;;  %v980_v23 = vmax.f32 %v3191_v59, %v2701_v34 }
 0x1e6   :  { %v1098_v3 = vpop.f32.mrf.mxu0  ;;  %v2953_v22 = vpop.f32.mrf.mxu1 }
 0x1e7   :  { %3184 = vst [vmem:[#allocation5_spill] sm:$0xff] %v2953_v22  ;;  %v3203_v56 = vmax.f32 %v2951_v29, %v2934_v0 }
 0x1ea   :  { %v1014_v54 = vpop.f32.mrf.mxu3 }
 0x1eb   :  { %v1062_v31 = vmax.f32 %v978_v20, %v1014_v54  ;;  %v981_v54 = vmax.f32 %v3194_v44, %v2719_v26 }
 0x1ed   :  { %v2964_v57 = vmax.f32 %v1062_v31, %v1098_v3 }
 0x1ee   :  { %v1101_v41 = vpop.f32.mrf.mxu0  ;;  %v2966_v47 = vpop.f32.mrf.mxu1 }
 0x1ef   :  { %3186 = vst [vmem:[#allocation7_spill] sm:$0xff] %v2964_v57 }
 0x1f0   :  { %3187 = vst [vmem:[#allocation6_spill] sm:$0xff] %v2966_v47  ;;  %v3201_v47 = vmax.f32 %v2891_v11, %v2868_v38 }
 0x1f2   :  { %v1017_v50 = vpop.f32.mrf.mxu3 }
 0x1f3   :  { %v1063_v15 = vmax.f32 %v979_v49, %v1017_v50  ;;  %v3197_v49 = vmax.f32 %v2736_v10, %v2723_v1 }
 0x1f5   :  { %v2974_v45 = vmax.f32 %v1063_v15, %v1101_v41  ;;  %v982_v50 = vmax.f32 %v3197_v49, %v2734_v61 }
 0x1f6   :  { %v1104_v60 = vpop.f32.mrf.mxu0  ;;  %v2976_v25 = vpop.f32.mrf.mxu1 }
 0x1f7   :  { %3189 = vst [vmem:[#allocation8_spill] sm:$0xff] %v2974_v45 }
 0x1f8   :  { %3190 = vst [vmem:[#allocation9_spill] sm:$0xff] %v2976_v25 }
 0x1fa   :  { %v1020_v3 = vpop.f32.mrf.mxu3 }
 0x1fb   :  { %v1064_v4 = vmax.f32 %v980_v23, %v1020_v3  ;;  %v3198_v23 = vmax.f32 %v2751_v12, %v2738_v58  ;;  %v1330_v12 = vpop.permute.xlu1 %1329 }
 0x1fd   :  { %v2984_v20 = vmax.f32 %v1064_v4, %v1104_v60  ;;  %v983_v3 = vmax.f32 %v3198_v23, %v2749_v32 }
 0x1fe   :  { %v1107_v37 = vpop.f32.mrf.mxu0  ;;  %v2986_v53 = vpop.f32.mrf.mxu1 }
 0x1ff   :  { %3192 = vst [vmem:[#allocation10_spill] sm:$0xff] %v2984_v20 }
 0x200   :  { %3193 = vst [vmem:[#allocation11_spill] sm:$0xff] %v2986_v53  ;;  %v3202_v53 = vmax.f32 %v2866_v24, %v2846_v18  ;;  %v3205_v18 = vmax.f32 %v2822_v16, %v2801_v5 }
 0x202   :  { %v1023_v31 = vpop.f32.mrf.mxu3 }
 0x203   :  { %v1065_v41 = vmax.f32 %v981_v54, %v1023_v31  ;;  %v3199_v54 = vmax.f32 %v2766_v13, %v2753_v6  ;;  %v1325_v20 = vpop.permute.xlu1 %1324 }
 0x205   :  { %v2994_v27 = vmax.f32 %v1065_v41, %v1107_v37  ;;  %v984_v31 = vmax.f32 %v3199_v54, %v2764_v30 }
 0x206   :  { %v1110_v39 = vpop.f32.mrf.mxu0  ;;  %v2996_v34 = vpop.f32.mrf.mxu1 }
 0x207   :  { %3195 = vst [vmem:[#allocation12_spill] sm:$0xff] %v2994_v27 }
 0x208   :  { %3196 = vst [vmem:[#allocation13_spill] sm:$0xff] %v2996_v34 }
 0x20a   :  { %v1026_v15 = vpop.f32.mrf.mxu3 }
 0x20b   :  { %v1066_v60 = vmax.f32 %v982_v50, %v1026_v15  ;;  %v3200_v50 = vmax.f32 %v2781_v14, %v2768_v2 }
 0x20d   :  { %v3004_v59 = vmax.f32 %v1066_v60, %v1110_v39  ;;  %v985_v15 = vmax.f32 %v3200_v50, %v2779_v9  ;;  %v957_v60 = vpop.f32.mrf.mxu2 }
 0x20e   :  { %v1113_v21 = vpop.f32.mrf.mxu0  ;;  %v3006_v26 = vpop.f32.mrf.mxu1  ;;  %v987_v24 = vmax.f32 %v3205_v18, %v957_v60 }
 0x212   :  { %v1029_v4 = vpop.f32.mrf.mxu3 }
 0x213   :  { %v1067_v37 = vmax.f32 %v983_v3, %v1029_v4  ;;  %v1320_v3 = vpop.permute.xlu2 %1319 }
 0x215   :  { %v3014_v44 = vmax.f32 %v1067_v37, %v1113_v21  ;;  %v960_v37 = vpop.f32.mrf.mxu2 }
 0x216   :  { %v1116_v1 = vpop.f32.mrf.mxu0  ;;  %v3016_v61 = vpop.f32.mrf.mxu1 }
 0x21a   :  { %v1032_v41 = vpop.f32.mrf.mxu3 }
 0x21b   :  { %v1068_v39 = vmax.f32 %v984_v31, %v1032_v41  ;;  %v1315_v34 = vpop.permute.xlu2 %1314 }
 0x21d   :  { %v3024_v49 = vmax.f32 %v1068_v39, %v1116_v1  ;;  %v963_v41 = vpop.f32.mrf.mxu2 }
 0x21e   :  { %v1119_v58 = vpop.f32.mrf.mxu0  ;;  %v3026_v32 = vpop.f32.mrf.mxu1  ;;  %v989_v27 = vmax.f32 %v3202_v53, %v963_v41 }
 0x222   :  { %v1035_v21 = vpop.f32.mrf.mxu3 }
 0x223   :  { %v1069_v23 = vmax.f32 %v985_v15, %v1035_v21  ;;  %v1300_v60 = vpop.permute.xlu2 %1299 }
 0x225   :  { %v3034_v6 = vmax.f32 %v1069_v23, %v1119_v58  ;;  %v966_v23 = vpop.f32.mrf.mxu2 }
 0x226   :  { %v1122_v30 = vpop.f32.mrf.mxu0  ;;  %v3036_v13 = vpop.f32.mrf.mxu1  ;;  %v990_v45 = vmax.f32 %v3201_v47, %v966_v23 }
 0x227   :  { %v1310_v47 = vpop.permute.xlu0 %1309 }
 0x22a   :  { %v1038_v4 = vpop.f32.mrf.mxu3 }
 0x22b   :  { %v1070_v1 = vmax.f32 %v2812_v36, %v1038_v4 }
 0x22d   :  { %v3041_v54 = vmax.f32 %v1070_v1, %v1122_v30  ;;  %v969_v4 = vpop.f32.mrf.mxu2 }
 0x22e   :  { %v1125_v31 = vpop.f32.mrf.mxu0  ;;  %v3043_v2 = vpop.f32.mrf.mxu1  ;;  %v991_v17 = vmax.f32 %v907_v19, %v969_v4  ;;  %v3208_v4 = vmax.f32 %v3024_v49, %v3016_v61 }
 0x232   :  { %v1041_v14 = vpop.f32.mrf.mxu3 }
 0x235   :  { %v972_v10 = vpop.f32.mrf.mxu2 }
 0x236   :  { %v1128_v39 = vpop.f32.mrf.mxu0  ;;  %v3047_v58 = vpop.f32.mrf.mxu1  ;;  %v992_v33 = vmax.f32 %v908_v35, %v972_v10 }
 0x23a   :  { %v1044_v50 = vpop.f32.mrf.mxu3 }
 0x23d   :  { %v975_v57 = vpop.f32.mrf.mxu2 }
 0x23e   :  { %v1131_v15 = vpop.f32.mrf.mxu0  ;;  %v3049_v21 = vpop.f32.mrf.mxu1  ;;  %v993_v28 = vmax.f32 %v3203_v56, %v975_v57 }
 0x242   :  { %v1047_v51 = vpop.f32.mrf.mxu3 }
 0x243   :  { %v1073_v11 = vmax.f32 %v989_v27, %v1047_v51 }
 0x246   :  { %v1134_v36 = vpop.f32.mrf.mxu0  ;;  %v1218_v30 = vpop.f32.mrf.mxu1 }
 0x24a   :  { %v1050_v1 = vpop.f32.mrf.mxu3 }
 0x24b   :  { %v1074_v35 = vmax.f32 %v990_v45, %v1050_v1  ;;  %v1157_v45 = vmax.f32 %v1073_v11, %v1131_v15 }
 0x24d   :  { %v1158_v0 = vmax.f32 %v1074_v35, %v1134_v36  ;;  %v1241_v27 = vmax.f32 %v1157_v45, %v3049_v21  ;;  %v3206_v21 = vmax.f32 %v3041_v54, %v3036_v13  ;;  %v1285_v36 = vpop.permute.xlu2 %1284  ;;  %v3209_v13 = vmax.f32 %v3014_v44, %v3006_v26  ;;  %v3210_v35 = vld [vmem:[#allocation13_spill] sm:$0xff] }
 0x24e   :  { %v1137_v42 = vpop.f32.mrf.mxu0  ;;  %v1221_v46 = vpop.f32.mrf.mxu1 }
 0x24f   :  { %v1353_v15 = vadd.f32 %v1320_v3, %v1241_v27  ;;  %v1379_v27 = vld [vmem:[%s3156_s3 + $0x28] sm:$0xff] }
 0x251   :  { %v1369_v23 = vmax.f32 %v1353_v15, 0.0  ;;  %v1388_v15 = vld [vmem:[%s3156_s3 + $0x70] sm:$0xff] }
 0x252   :  { %v1053_v8 = vpop.f32.mrf.mxu3 }
 0x253   :  { %v1075_v25 = vmax.f32 %v991_v17, %v1053_v8 }
 0x255   :  { %v1159_v17 = vmax.f32 %v1075_v25, %v1137_v42  ;;  %v1305_v25 = vpop.permute.xlu1 %1304  ;;  %v1270_v11 = vpop.permute.xlu2 %1269 }
 0x256   :  { %v1140_v9 = vpop.f32.mrf.mxu0  ;;  %v1224_v63 = vpop.f32.mrf.mxu1 }
 0x257   :  { %v1243_v10 = vmax.f32 %v1159_v17, %v1221_v46  ;;  %v3215_v17 = vld [vmem:[#allocation10_spill] sm:$0xff] }
 0x259   :  { %v1355_v5 = vadd.f32 %v1330_v12, %v1243_v10 }
 0x25a   :  { %v1056_v40 = vpop.f32.mrf.mxu3 }
 0x25b   :  { %v1076_v22 = vmax.f32 %v992_v33, %v1056_v40  ;;  %v3204_v33 = vmax.f32 %v2844_v7, %v2824_v52  ;;  %v1242_v52 = vmax.f32 %v1158_v0, %v1218_v30 }
 0x25d   :  { %v1160_v48 = vmax.f32 %v1076_v22, %v1140_v9  ;;  %v988_v38 = vmax.f32 %v3204_v33, %v960_v37  ;;  %v1071_v22 = vmax.f32 %v987_v24, %v1041_v14  ;;  %v1295_v14 = vpop.permute.xlu0 %1294  ;;  %v1290_v12 = vpop.permute.xlu1 %1289  ;;  %v3213_v33 = vld [vmem:[#allocation11_spill] sm:$0xff] }
 0x25e   :  { %v1143_v40 = vpop.f32.mrf.mxu0  ;;  %v1227_v53 = vpop.f32.mrf.mxu1  ;;  %v1348_v1 = vadd.f32 %v1295_v14, %v3208_v4  ;;  %v1347_v54 = vadd.f32 %v1290_v12, %v3209_v13  ;;  %v1386_v14 = vld [vmem:[%s3156_s3 + $0x60] sm:$0xff] }
 0x25f   :  { %v1072_v8 = vmax.f32 %v988_v38, %v1044_v50  ;;  %v1244_v29 = vmax.f32 %v1160_v48, %v1224_v63  ;;  %v1155_v42 = vmax.f32 %v1071_v22, %v1125_v31  ;;  %v1354_v50 = vadd.f32 %v1325_v20, %v1242_v52  ;;  %v1374_v52 = vld [vmem:[%s3156_s3] sm:$0xff] }
 0x260   :  { %v3211_v48 = vmax.f32 %v3004_v59, %v3210_v35  ;;  %v1363_v49 = vmax.f32 %v1347_v54, 0.0  ;;  %v3219_v59 = vld [vmem:[#allocation6_spill] sm:$0xff] }
 0x261   :  { %v1156_v41 = vmax.f32 %v1072_v8, %v1128_v39  ;;  %v1356_v7 = vadd.f32 %v1335_v55, %v1244_v29  ;;  %v1239_v46 = vmax.f32 %v1155_v42, %v3043_v2  ;;  %v1371_v39 = vmax.f32 %v1355_v5, 0.0  ;;  %v3221_v29 = vld [vmem:[#allocation7_spill] sm:$0xff]  ;;  %v1378_v42 = vld [vmem:[%s3156_s3 + $0x20] sm:$0xff] }
 0x262   :  { %v1059_v43 = vpop.f32.mrf.mxu3  ;;  %v3207_v2 = vmax.f32 %v3034_v6, %v3026_v32  ;;  %v1346_v32 = vadd.f32 %v1285_v36, %v3211_v48  ;;  %v1364_v6 = vmax.f32 %v1348_v1, 0.0  ;;  %v1380_v5 = vld [vmem:[%s3156_s3 + $0x30] sm:$0xff] }
 0x263   :  { %v1077_v19 = vmax.f32 %v993_v28, %v1059_v43  ;;  %v1240_v37 = vmax.f32 %v1156_v41, %v3047_v58  ;;  %v1372_v63 = vmax.f32 %v1356_v7, 0.0  ;;  %v1351_v31 = vadd.f32 %v1310_v47, %v1239_v46  ;;  %v3218_v47 = vld [vmem:[#allocation8_spill] sm:$0xff]  ;;  %v1375_v7 = vld [vmem:[%s3156_s3 + $0x8] sm:$0xff] }
 0x264   :  { %v1350_v58 = vadd.f32 %v1305_v25, %v3206_v21  ;;  %v1349_v3 = vadd.f32 %v1300_v60, %v3207_v2  ;;  %v1362_v18 = vmax.f32 %v1346_v32, 0.0  ;;  %v1377_v25 = vld [vmem:[%s3156_s3 + $0x18] sm:$0xff]  ;;  %v1382_v60 = vld [vmem:[%s3156_s3 + $0x40] sm:$0xff]  ;;  %v1387_v46 = vld [vmem:[%s3156_s3 + $0x68] sm:$0xff] }
 0x265   :  { %v1161_v57 = vmax.f32 %v1077_v19, %v1143_v40  ;;  %v1352_v55 = vadd.f32 %v1315_v34, %v1240_v37  ;;  %v1367_v30 = vmax.f32 %v1351_v31, 0.0  ;;  %v1280_v34 = vpop.permute.xlu0 %1279  ;;  %v1275_v43 = vpop.permute.xlu1 %1274  ;;  %v3212_v40 = vld [vmem:[#allocation12_spill] sm:$0xff]  ;;  %v3216_v19 = vld [vmem:[#allocation9_spill] sm:$0xff]  ;;  %v1383_v37 = vld [vmem:[%s3156_s3 + $0x48] sm:$0xff] }
 0x266   :  { %v1366_v56 = vmax.f32 %v1350_v58, 0.0  ;;  %v1365_v28 = vmax.f32 %v1349_v3, 0.0  ;;  %v3214_v38 = vmax.f32 %v3212_v40, %v3213_v33  ;;  %v3217_v26 = vmax.f32 %v3215_v17, %v3216_v19 }
 0x267   :  { %v1245_v9 = vmax.f32 %v1161_v57, %v1227_v53  ;;  %v1368_v20 = vmax.f32 %v1352_v55, 0.0  ;;  %v3220_v53 = vmax.f32 %v3218_v47, %v3219_v59  ;;  %v3222_v57 = vld [vmem:[#allocation5_spill] sm:$0xff] }
 0x268   :  { %v1345_v61 = vadd.f32 %v1280_v34, %v3214_v38  ;;  %v1344_v44 = vadd.f32 %v1275_v43, %v3217_v26  ;;  %v3223_v22 = vmax.f32 %v3221_v29, %v3222_v57 }
 0x269   :  { %v1357_v51 = vadd.f32 %v1340_v62, %v1245_v9  ;;  %v1370_v62 = vmax.f32 %v1354_v50, 0.0  ;;  %v1343_v8 = vadd.f32 %v1270_v11, %v3220_v53  ;;  %v1384_v50 = vld [vmem:[%s3156_s3 + $0x50] sm:$0xff] }
 0x26a   :  { %v1361_v0 = vmax.f32 %v1345_v61, 0.0  ;;  %v1360_v10 = vmax.f32 %v1344_v44, 0.0 }
 0x26b   :  { %v1373_v16 = vmax.f32 %v1357_v51, 0.0  ;;  %v1359_v9 = vmax.f32 %v1343_v8, 0.0  ;;  %v1376_v51 = vld [vmem:[%s3156_s3 + $0x10] sm:$0xff] }
 0x26d   :  { %1486 = vmatpush.msrb.mxu2 %v1373_v16  ;;  %v1265_v24 = vpop.permute.xlu0 %1264  ;;  %v1381_v16 = vld [vmem:[%s3156_s3 + $0x38] sm:$0xff]  ;;  %v1409_v55 = vpop.permute.xlu1 %1408 }
 0x26e   :  { %v1342_v45 = vadd.f32 %v1265_v24, %v3223_v22 }
 0x26f   :  { %1487 = vmatpush.msrb.mxu2 %v1372_v63  ;;  %v1385_v63 = vld [vmem:[%s3156_s3 + $0x58] sm:$0xff] }
 0x270   :  { %v1358_v41 = vmax.f32 %v1342_v45, 0.0 }
 0x271   :  { %1488 = vmatpush.msrb.mxu2 %v1371_v39  ;;  %v1389_v39 = vld [vmem:[%s3156_s3 + $0x78] sm:$0xff]  ;;  %s1859_s3 = smov [#allocation2]  }
 0x272   :  { %s1571_s6 = sshll.u32 %s1859_s3, 4  ;;  %s1572_s6 = int_to_ptr.vmem [resolvable:$true] %s1571_s6 }
 0x273   :  { %1489 = vmatpush.msrb.mxu2 %v1370_v62 }
 0x275   :  { %1490 = vmatpush.msrb.mxu2 %v1369_v23  ;;  %v1414_v23 = vpop.permute.xlu2 %1413  ;;  %v1419_v58 = vpop.permute.xlu0 %1418 }
 0x276   :  { %v1424_v2 = vpop.permute.xlu1 %1423 }
 0x277   :  { %1491 = vmatpush.msrb.mxu2 %v1368_v20 }
 0x279   :  { %1492 = vmatpush.msrb.mxu2 %v1367_v30 }
 0x27b   :  { %1493 = vmatpush.msrb.mxu2 %v1366_v56 }
 0x27d   :  { %1494 = vmatpush.msrb.mxu2 %v1365_v28  ;;  %v1429_v34 = vpop.permute.xlu2 %1428  ;;  %v1434_v56 = vpop.permute.xlu0 %1433 }
 0x27e   :  { %v1439_v28 = vpop.permute.xlu1 %1438 }
 0x27f   :  { %1495 = vmatpush.msrb.mxu2 %v1364_v6 }
 0x281   :  { %1496 = vmatpush.msrb.mxu2 %v1363_v49 }
 0x283   :  { %1497 = vmatpush.msrb.mxu2 %v1362_v18 }
 0x285   :  { %1498 = vmatpush.msrb.mxu2 %v1361_v0  ;;  %v1444_v32 = vpop.permute.xlu2 %1443  ;;  %v1449_v40 = vpop.permute.xlu0 %1448 }
 0x286   :  { %v1454_v61 = vpop.permute.xlu1 %1453 }
 0x287   :  { %1499 = vmatpush.msrb.mxu2 %v1360_v10 }
 0x289   :  { %1500 = vmatpush.msrb.mxu2 %v1359_v9 }
 0x28b   :  { %1501 = vmatpush.msrb.mxu2 %v1358_v41 }
 0x28c   :  { %1502 = vmatmul.f32.vlgmr.msrb.gmra.mxu2 %v1374_v52 }
 0x28d   :  { %v1459_v17 = vpop.permute.xlu2 %1458  ;;  %v1464_v44 = vpop.permute.xlu0 %1463 }
 0x28e   :  { %v1469_v47 = vpop.permute.xlu1 %1468 }
 0x294   :  { %1505 = vmatmul.f32.gmra.mxu2 %v1375_v7 }
 0x295   :  { %v1474_v8 = vpop.permute.xlu2 %1473  ;;  %v1479_v57 = vpop.permute.xlu0 %1478 }
 0x296   :  { %v1484_v10 = vpop.permute.xlu1 %1483 }
 0x29c   :  { %1508 = vmatmul.f32.gmra.mxu2 %v1376_v51 }
 0x2a4   :  { %1511 = vmatmul.f32.gmra.mxu2 %v1377_v25 }
 0x2ac   :  { %1514 = vmatmul.f32.gmra.mxu2 %v1378_v42 }
 0x2b4   :  { %1517 = vmatmul.f32.gmra.mxu2 %v1379_v27 }
 0x2bc   :  { %1520 = vmatmul.f32.gmra.mxu2 %v1380_v5 }
 0x2c4   :  { %1523 = vmatmul.f32.gmra.mxu2 %v1381_v16 }
 0x2cc   :  { %1526 = vmatmul.f32.gmra.mxu2 %v1382_v60 }
 0x2d4   :  { %1529 = vmatmul.f32.gmra.mxu2 %v1383_v37 }
 0x2dc   :  { %1532 = vmatmul.f32.gmra.mxu2 %v1384_v50 }
 0x2e4   :  { %1535 = vmatmul.f32.gmra.mxu2 %v1385_v63 }
 0x2ec   :  { %1538 = vmatmul.f32.gmra.mxu2 %v1386_v14 }
 0x2f4   :  { %1541 = vmatmul.f32.gmra.mxu2 %v1387_v46 }
 0x2fc   :  { %1544 = vmatmul.f32.gmra.mxu2 %v1388_v15 }
 0x304   :  { %1547 = vmatmul.f32.gmra.mxu2 %v1389_v39 }
 0x30f   :  { %v1503_v62 = vpop.f32.mrf.mxu2 }
 0x310   :  { %v1504_v31 = vadd.f32 %v1503_v62, %v1409_v55 }
 0x312   :  { %1551 = vst [vmem:[#allocation2] sm:$0xff] %v1504_v31 }
 0x317   :  { %v1506_v12 = vpop.f32.mrf.mxu2 }
 0x318   :  { %v1507_v21 = vadd.f32 %v1506_v12, %v1414_v23 }
 0x31a   :  { %1552 = vst [vmem:[#allocation2 + $0x8] sm:$0xff] %v1507_v21 }
 0x31f   :  { %v1509_v20 = vpop.f32.mrf.mxu2 }
 0x320   :  { %v1510_v36 = vadd.f32 %v1509_v20, %v1419_v58 }
 0x322   :  { %1553 = vst [vmem:[#allocation2 + $0x10] sm:$0xff] %v1510_v36 }
 0x327   :  { %v1512_v3 = vpop.f32.mrf.mxu2 }
 0x328   :  { %v1513_v30 = vadd.f32 %v1512_v3, %v1424_v2 }
 0x32a   :  { %1554 = vst [vmem:[#allocation2 + $0x18] sm:$0xff] %v1513_v30 }
 0x32f   :  { %v1515_v4 = vpop.f32.mrf.mxu2 }
 0x330   :  { %v1516_v1 = vadd.f32 %v1515_v4, %v1429_v34 }
 0x332   :  { %1555 = vst [vmem:[#allocation2 + $0x20] sm:$0xff] %v1516_v1 }
 0x337   :  { %v1518_v13 = vpop.f32.mrf.mxu2 }
 0x338   :  { %v1519_v54 = vadd.f32 %v1518_v13, %v1434_v56 }
 0x33a   :  { %1556 = vst [vmem:[#allocation2 + $0x28] sm:$0xff] %v1519_v54 }
 0x33f   :  { %v1521_v35 = vpop.f32.mrf.mxu2 }
 0x340   :  { %v1522_v48 = vadd.f32 %v1521_v35, %v1439_v28 }
 0x342   :  { %1557 = vst [vmem:[#allocation2 + $0x30] sm:$0xff] %v1522_v48 }
 0x347   :  { %v1524_v6 = vpop.f32.mrf.mxu2 }
 0x348   :  { %v1525_v43 = vadd.f32 %v1524_v6, %v1444_v32 }
 0x34a   :  { %1558 = vst [vmem:[#allocation2 + $0x38] sm:$0xff] %v1525_v43 }
 0x34f   :  { %v1527_v33 = vpop.f32.mrf.mxu2 }
 0x350   :  { %v1528_v38 = vadd.f32 %v1527_v33, %v1449_v40 }
 0x352   :  { %1559 = vst [vmem:[#allocation2 + $0x40] sm:$0xff] %v1528_v38 }
 0x357   :  { %v1530_v49 = vpop.f32.mrf.mxu2 }
 0x358   :  { %v1531_v11 = vadd.f32 %v1530_v49, %v1454_v61 }
 0x35a   :  { %1560 = vst [vmem:[#allocation2 + $0x48] sm:$0xff] %v1531_v11 }
 0x35f   :  { %v1533_v19 = vpop.f32.mrf.mxu2 }
 0x360   :  { %v1534_v26 = vadd.f32 %v1533_v19, %v1459_v17 }
 0x362   :  { %1561 = vst [vmem:[#allocation2 + $0x50] sm:$0xff] %v1534_v26 }
 0x367   :  { %v1536_v18 = vpop.f32.mrf.mxu2 }
 0x368   :  { %v1537_v24 = vadd.f32 %v1536_v18, %v1464_v44 }
 0x36a   :  { %1562 = vst [vmem:[#allocation2 + $0x58] sm:$0xff] %v1537_v24 }
 0x36f   :  { %v1539_v59 = vpop.f32.mrf.mxu2 }
 0x370   :  { %v1540_v53 = vadd.f32 %v1539_v59, %v1469_v47 }
 0x372   :  { %1563 = vst [vmem:[#allocation2 + $0x60] sm:$0xff] %v1540_v53 }
 0x377   :  { %v1542_v0 = vpop.f32.mrf.mxu2 }
 0x378   :  { %v1543_v29 = vadd.f32 %v1542_v0, %v1474_v8 }
 0x37a   :  { %1564 = vst [vmem:[#allocation2 + $0x68] sm:$0xff] %v1543_v29 }
 0x37f   :  { %v1545_v22 = vpop.f32.mrf.mxu2 }
 0x380   :  { %v1546_v45 = vadd.f32 %v1545_v22, %v1479_v57 }
 0x382   :  { %1565 = vst [vmem:[#allocation2 + $0x70] sm:$0xff] %v1546_v45 }
 0x387   :  { %v1548_v9 = vpop.f32.mrf.mxu2 }
 0x388   :  { %v1549_v41 = vadd.f32 %v1548_v9, %v1484_v10 }
 0x38a   :  { %1566 = vst [vmem:[#allocation2 + $0x78] sm:$0xff] %v1549_v41 }
 0x38b   :  { %1579 = dma.vmem_to_hbm [thread:$0]  %s1572_s6, 2048, %s1574_s0, [#allocation3], %s1860_s9, %s1860_s9, %s1861_s10  }
 0x38c   :  { %1856 = dma.done.wait [#allocation3], 2048  }
 0x38d   :  { %1857 = vsyncadd [#allocation3], 4294965248 }
 0x38e   :  { %1584 = vsyncpa [#allocation3], 1 }

</bundles_post_ra>
